<compile_context>
chip_gen: v7x
topology: tpu7x:2x2x1
jax: 0.10.0
libtpu: 0.0.40
codegen_flags: <defaults>
</compile_context>

<pallas_src>
import jax
import jax.numpy as jnp
from jax.experimental import pallas as pl
from jax.experimental.pallas import tpu as pltpu

FILTER_SIZES = (2, 3, 4)
NUM_FILTERS = 256
EMBEDDING_DIM = 32   # small stand-in for BERT hidden size
NUM_CLASSES = 4
SEQ_LEN = 8
BATCH = 16           # multiple of the batch tile (8) so the grid actually iterates
K_MAX = max(FILTER_SIZES)


# -----------------------------------------------------------------------------
# Fused kernel (one grid step = one batch tile):
#   x_ref    : (TB, L, E)        VMEM  bf16 encoder output tile
#   wc_ref   : (K_MAX*E, 3F)     VMEM  bf16 packed conv weights (resident)
#   bc_ref   : (1, 3F)           VMEM  f32  packed conv biases  (resident)
#   mask_ref : (L, 3F)           VMEM  f32  time-validity mask  (resident, precomputed)
#   fcw_ref  : (3F, C)           VMEM  bf16 FC weight           (resident)
#   fcb_ref  : (1, C)            VMEM  f32  FC bias             (resident)
#   o_ref    : (TB, C)           VMEM  f32  logits tile
# -----------------------------------------------------------------------------
def fused_textcnn_kernel(x_ref, wc_ref, bc_ref, mask_ref, fcw_ref, fcb_ref, o_ref):
    TB, L, E = x_ref.shape
    kmax = wc_ref.shape[0] // E
    c3f = wc_ref.shape[1]                                        # 3 * NUM_FILTERS

    x = x_ref[...]                                               # bf16 (TB, L, E)

    if kmax * E <= 128:
        # Toy E: im2col exactly fills the 128-wide MXU contraction dim — one matmul
        # for all three branches.
        pad = jnp.zeros((TB, kmax - 1, E), x.dtype)
        xp = jnp.concatenate([x, pad], axis=1)                   # (TB, L+kmax-1, E)
        cols = jnp.concatenate(
            [xp[:, j:j + L, :] for j in range(kmax)], axis=-1)   # (TB, L, kmax*E)
        cols2d = cols.reshape(TB * L, kmax * E)
        conv = jnp.dot(cols2d, wc_ref[...],
                       preferred_element_type=jnp.float32)       # (TB*L, 3F) f32
    else:
        # Production E: K-tap accumulate form — never materializes the K_MAX-times
        # larger im2col operand in VMEM (critical on v7x's 64 MiB VMEM).
        conv = jnp.zeros((TB * L, c3f), jnp.float32)
        for j in range(kmax):                                    # static, K_MAX iterations
            if j == 0:
                xs = x
            else:
                xs = jnp.concatenate(
                    [x[:, j:, :], jnp.zeros((TB, j, E), x.dtype)], axis=1)
            conv = conv + jnp.dot(xs.reshape(TB * L, E),
                                  wc_ref[j * E:(j + 1) * E, :],
                                  preferred_element_type=jnp.float32)

    conv = jnp.maximum(conv + bc_ref[...], 0.0)                  # bias + ReLU

    # Mask time positions whose conv window runs into the zero padding.
    # NOTE: multiplicative 0-mask *after* ReLU is only correct because ReLU guarantees
    # every valid entry is >= 0, so a masked 0 never beats the per-branch max.
    conv = conv.reshape(TB, L, c3f) * mask_ref[...][None, :, :]

    # Max-pool over time per branch (branch concat is implicit in the packed layout).
    feat = jnp.max(conv, axis=1)                                 # (TB, 3F) f32

    # Dropout = identity (inference); final Linear(3F, C) in bf16 with f32 accumulation.
    logits = jnp.dot(feat.astype(jnp.bfloat16), fcw_ref[...],
                     preferred_element_type=jnp.float32) + fcb_ref[...]
    o_ref[...] = logits.astype(o_ref.dtype)                      # lane-underfilled (C=4): fine at this size


# -----------------------------------------------------------------------------
# One-time parameter / constant layout transforms (outside the per-call hot path).
# -----------------------------------------------------------------------------
def pack_conv_params(conv_weights, conv_biases):
    """Pad each (k, E, F) conv weight to (K_MAX, E, F), flatten to (K_MAX*E, F), concat
    the branches along the filter axis, cast to bf16. Biases concat to (1, 3F)."""
    ws = []
    for k, w in zip(FILTER_SIZES, conv_weights):
        w_pad = jnp.pad(w, ((0, K_MAX - k), (0, 0), (0, 0)))
        ws.append(w_pad.reshape(K_MAX * w.shape[1], w.shape[2]))
    w_packed = jnp.concatenate(ws, axis=1).astype(jnp.bfloat16)  # (K_MAX*E, 3F)
    b_packed = jnp.concatenate(conv_biases, axis=1)              # (1, 3F) f32
    return w_packed, b_packed


def make_time_mask(L):
    """(L, 3F) validity mask: 1.0 where a window of size k (per branch) fits in the sequence."""
    t = jnp.arange(L, dtype=jnp.int32)[:, None]                                  # (L, 1)
    limits = jnp.repeat(
        jnp.array([L - k + 1 for k in FILTER_SIZES], jnp.int32), NUM_FILTERS)[None, :]  # (1, 3F)
    return (t < limits).astype(jnp.float32)


# -----------------------------------------------------------------------------
# Wrapper: batch-tiled pallas_call with resident weights and a parallel batch axis.
# -----------------------------------------------------------------------------
def model_cnn_forward(encoder_out, w_conv_packed, b_conv_packed, time_mask, fc_w, fc_b):
    B, L, E = encoder_out.shape
    c3f = w_conv_packed.shape[1]
    num_classes = fc_w.shape[1]

    # Batch tile: 8 keeps the output block (TB, C) layout-legal and gives >1 grid step.
    # At production sizes re-derive TB so 2*(x tile + intermediates) + weights fits the
    # per-generation VMEM budget (v7x: 64 MiB physical).
    TB = 8 if (B % 8 == 0 and B >= 8) else B
    grid = (B // TB,)

    # bf16 inputs: halves the dominant HBM->VMEM DMA and feeds the MXU its native dtype.
    x_bf16 = encoder_out.astype(jnp.bfloat16)
    fcw_bf16 = fc_w.astype(jnp.bfloat16)

    flops = 2 * B * L * w_conv_packed.shape[0] * c3f + 2 * B * c3f * num_classes
    bytes_accessed = int(
        x_bf16.size * 2 + w_conv_packed.size * 2 + b_conv_packed.size * 4
        + time_mask.size * 4 + fcw_bf16.size * 2 + fc_b.size * 4
        + B * num_classes * 4)

    return pl.pallas_call(
        fused_textcnn_kernel,
        out_shape=jax.ShapeDtypeStruct((B, num_classes), jnp.float32),
        grid=grid,
        in_specs=[
            # Batch-tiled activation (pipelined / double-buffered across grid steps).
            pl.BlockSpec((TB, L, E), lambda b: (b, 0, 0)),
            # Weights / bias / mask: constant block index -> fetched once, stay resident.
            pl.BlockSpec(w_conv_packed.shape, lambda b: (0, 0)),
            pl.BlockSpec(b_conv_packed.shape, lambda b: (0, 0)),
            pl.BlockSpec(time_mask.shape, lambda b: (0, 0)),
            pl.BlockSpec(fcw_bf16.shape, lambda b: (0, 0)),
            pl.BlockSpec(fc_b.shape, lambda b: (0, 0)),
        ],
        out_specs=pl.BlockSpec((TB, num_classes), lambda b: (b, 0)),
        compiler_params=pltpu.CompilerParams(
            dimension_semantics=("parallel",),          # megacore / 2-TC sharding on v7x
            vmem_limit_bytes=32 * 1024 * 1024),
        cost_estimate=pl.CostEstimate(
            flops=flops, transcendentals=0, bytes_accessed=bytes_accessed),
    )(x_bf16, w_conv_packed, b_conv_packed, time_mask, fcw_bf16, fc_b)


# -----------------------------------------------------------------------------
# Pure-JAX f32 reference mirroring the PyTorch forward (eval mode).
# -----------------------------------------------------------------------------
def model_cnn_reference(encoder_out, conv_weights, conv_biases, fc_w, fc_b):
    B, L, E = encoder_out.shape
    feats = []
    for k, w, b in zip(FILTER_SIZES, conv_weights, conv_biases):
        l_out = L - k + 1
        acc = jnp.zeros((B, l_out, NUM_FILTERS), jnp.float32)
        for j in range(k):
            acc += jnp.einsum("ble,ef->blf", encoder_out[:, j:j + l_out, :], w[j])
        acc = jnp.maximum(acc + b[None, :, :], 0.0)
        feats.append(jnp.max(acc, axis=1))
    feat = jnp.concatenate(feats, axis=1)
    return feat @ fc_w + fc_b


if __name__ == "__main__":
    key = jax.random.PRNGKey(0)
    k_x, k_fc, *k_convs = jax.random.split(key, 2 + len(FILTER_SIZES))

    # Simulated BERT encoder output (B, L, E)
    encoder_out = jax.random.normal(k_x, (BATCH, SEQ_LEN, EMBEDDING_DIM), jnp.float32)

    # Conv params: PyTorch (F, 1, k, E) -> stored as (k, E, F); bias (F,) -> (1, F)
    conv_weights, conv_biases = [], []
    for k, kk in zip(FILTER_SIZES, k_convs):
        fan_in = k * EMBEDDING_DIM
        w = jax.random.normal(kk, (k, EMBEDDING_DIM, NUM_FILTERS), jnp.float32)
        w = w * (1.0 / jnp.sqrt(fan_in))
        b = jnp.full((1, NUM_FILTERS), 0.01, jnp.float32)
        conv_weights.append(w)
        conv_biases.append(b)

    # FC params: PyTorch (C, 3F) -> stored as (3F, C); bias (C,) -> (1, C)
    in_dim = NUM_FILTERS * len(FILTER_SIZES)
    fc_w = jax.random.normal(k_fc, (in_dim, NUM_CLASSES), jnp.float32) * (
        1.0 / jnp.sqrt(in_dim)
    )
    fc_b = jnp.zeros((1, NUM_CLASSES), jnp.float32)

    # One-time layout transforms (not part of the per-call hot path).
    w_conv_packed, b_conv_packed = pack_conv_params(conv_weights, conv_biases)
    time_mask = make_time_mask(SEQ_LEN)

    logits = model_cnn_forward(
        encoder_out, w_conv_packed, b_conv_packed, time_mask, fc_w, fc_b)
    logits = jax.block_until_ready(logits)

    ref = model_cnn_reference(encoder_out, conv_weights, conv_biases, fc_w, fc_b)
    assert logits.shape == (BATCH, NUM_CLASSES)
    # Tolerance loosened vs. the f32 reference: conv/FC operands are bf16 on the MXU
    # (accumulation stays f32), giving ~1e-2 relative operand-rounding error.
    assert jnp.allclose(logits, ref, rtol=5e-2, atol=5e-2)

    print("KERNEL_OK")
</pallas_src>

<mosaic_0001>
module attributes {stable_mosaic.version = 11 : i64} {
  func.func @fused_textcnn_kernel(%arg0: i32, %arg1: memref<8x8x32xbf16, #tpu.memory_space<vmem>>, %arg2: memref<128x768xbf16, #tpu.memory_space<vmem>>, %arg3: memref<1x768xf32, #tpu.memory_space<vmem>>, %arg4: memref<8x768xf32, #tpu.memory_space<vmem>>, %arg5: memref<768x4xbf16, #tpu.memory_space<vmem>>, %arg6: memref<1x4xf32, #tpu.memory_space<vmem>>, %arg7: memref<8x4xf32, #tpu.memory_space<vmem>>) attributes {dimension_semantics = [#tpu.dimension_semantics<parallel>], iteration_bounds = array<i64: 2>, scalar_prefetch = 0 : i64, scratch_operands = 0 : i64, tpu.core_type = #tpu.core_type<tc>, window_params = [{transform_indices = @transform_0, window_bounds = array<i64: 8, 8, 32>}, {pipeline_mode = #tpu.pipeline_mode<synchronous>, transform_indices = @transform_1, window_bounds = array<i64: 128, 768>}, {pipeline_mode = #tpu.pipeline_mode<synchronous>, transform_indices = @transform_2, window_bounds = array<i64: 1, 768>}, {pipeline_mode = #tpu.pipeline_mode<synchronous>, transform_indices = @transform_3, window_bounds = array<i64: 8, 768>}, {pipeline_mode = #tpu.pipeline_mode<synchronous>, transform_indices = @transform_4, window_bounds = array<i64: 768, 4>}, {pipeline_mode = #tpu.pipeline_mode<synchronous>, transform_indices = @transform_5, window_bounds = array<i64: 1, 4>}, {transform_indices = @transform_6, window_bounds = array<i64: 8, 4>}]} {
    %c0 = arith.constant 0 : index
    %c0_0 = arith.constant 0 : index
    %c0_1 = arith.constant 0 : index
    %0 = vector.load %arg1[%c0, %c0_0, %c0_1] : memref<8x8x32xbf16, #tpu.memory_space<vmem>>, vector<8x8x32xbf16>
    %cst = arith.constant 0.000000e+00 : bf16
    %1 = vector.broadcast %cst : bf16 to vector<8x3x32xbf16>
    %2 = tpu.concatenate %0, %1 in 1 : vector<8x8x32xbf16>, vector<8x3x32xbf16> -> vector<8x11x32xbf16>
    %3 = vector.extract_strided_slice %2 {offsets = [0, 0, 0], sizes = [8, 8, 32], strides = [1, 1, 1]} : vector<8x11x32xbf16> to vector<8x8x32xbf16>
    %4 = vector.extract_strided_slice %2 {offsets = [0, 1, 0], sizes = [8, 8, 32], strides = [1, 1, 1]} : vector<8x11x32xbf16> to vector<8x8x32xbf16>
    %5 = vector.extract_strided_slice %2 {offsets = [0, 2, 0], sizes = [8, 8, 32], strides = [1, 1, 1]} : vector<8x11x32xbf16> to vector<8x8x32xbf16>
    %6 = vector.extract_strided_slice %2 {offsets = [0, 3, 0], sizes = [8, 8, 32], strides = [1, 1, 1]} : vector<8x11x32xbf16> to vector<8x8x32xbf16>
    %7 = tpu.concatenate %3, %4, %5, %6 in 2 : vector<8x8x32xbf16>, vector<8x8x32xbf16>, vector<8x8x32xbf16>, vector<8x8x32xbf16> -> vector<8x8x128xbf16>
    %8 = vector.shape_cast %7 : vector<8x8x128xbf16> to vector<64x128xbf16>
    %c0_2 = arith.constant 0 : index
    %c0_3 = arith.constant 0 : index
    %9 = vector.load %arg2[%c0_2, %c0_3] : memref<128x768xbf16, #tpu.memory_space<vmem>>, vector<128x768xbf16>
    %cst_4 = arith.constant dense<0.000000e+00> : vector<64x768xf32>
    %10 = tpu.matmul %8, %9, %cst_4 {dimension_numbers = #tpu.dot_dimension_numbers<[1], [0], [0], [1], [0, 0, 1, 1], [], []>} : vector<64x128xbf16>, vector<128x768xbf16>, vector<64x768xf32> -> vector<64x768xf32>
    %c0_5 = arith.constant 0 : index
    %c0_6 = arith.constant 0 : index
    %11 = vector.load %arg3[%c0_5, %c0_6] : memref<1x768xf32, #tpu.memory_space<vmem>>, vector<1x768xf32>
    %12 = vector.broadcast %11 : vector<1x768xf32> to vector<64x768xf32>
    %13 = arith.addf %10, %12 : vector<64x768xf32>
    %cst_7 = arith.constant 0.000000e+00 : f32
    %14 = vector.broadcast %cst_7 : f32 to vector<64x768xf32>
    %15 = arith.maximumf %13, %14 : vector<64x768xf32>
    %16 = vector.shape_cast %15 : vector<64x768xf32> to vector<8x8x768xf32>
    %c0_8 = arith.constant 0 : index
    %c0_9 = arith.constant 0 : index
    %17 = vector.load %arg4[%c0_8, %c0_9] : memref<8x768xf32, #tpu.memory_space<vmem>>, vector<8x768xf32>
    %18 = vector.shape_cast %17 : vector<8x768xf32> to vector<1x8x768xf32>
    %19 = vector.broadcast %18 : vector<1x8x768xf32> to vector<8x8x768xf32>
    %20 = arith.mulf %16, %19 : vector<8x8x768xf32>
    %cst_10 = arith.constant dense<0xFF800000> : vector<8x768xf32>
    %21 = vector.multi_reduction <maximumf>, %20, %cst_10 [1] : vector<8x8x768xf32> to vector<8x768xf32>
    %22 = arith.truncf %21 : vector<8x768xf32> to vector<8x768xbf16>
    %c0_11 = arith.constant 0 : index
    %c0_12 = arith.constant 0 : index
    %23 = vector.load %arg5[%c0_11, %c0_12] : memref<768x4xbf16, #tpu.memory_space<vmem>>, vector<768x4xbf16>
    %cst_13 = arith.constant dense<0.000000e+00> : vector<8x4xf32>
    %24 = tpu.matmul %22, %23, %cst_13 {dimension_numbers = #tpu.dot_dimension_numbers<[1], [0], [0], [1], [0, 0, 1, 1], [], []>} : vector<8x768xbf16>, vector<768x4xbf16>, vector<8x4xf32> -> vector<8x4xf32>
    %c0_14 = arith.constant 0 : index
    %c0_15 = arith.constant 0 : index
    %25 = vector.load %arg6[%c0_14, %c0_15] : memref<1x4xf32, #tpu.memory_space<vmem>>, vector<1x4xf32>
    %26 = vector.broadcast %25 : vector<1x4xf32> to vector<8x4xf32>
    %27 = arith.addf %24, %26 : vector<8x4xf32>
    %c0_16 = arith.constant 0 : index
    %c0_17 = arith.constant 0 : index
    %28 = vector.load %arg7[%c0_16, %c0_17] : memref<8x4xf32, #tpu.memory_space<vmem>>, vector<8x4xf32>
    tpu.vector_store %arg7[%c0_16, %c0_17], %27 {strides = array<i32>} : memref<8x4xf32, #tpu.memory_space<vmem>>, vector<8x4xf32>,
    return
  }
  func.func @transform_0(%arg0: i32) -> (i32, i32, i32) {
    %c0_i32 = arith.constant 0 : i32
    %c0_i32_0 = arith.constant 0 : i32
    %c0_i32_1 = arith.constant 0 : i32
    return %arg0, %c0_i32, %c0_i32_0 : i32, i32, i32
  }
  func.func @transform_1(%arg0: i32) -> (i32, i32) {
    %c0_i32 = arith.constant 0 : i32
    %c0_i32_0 = arith.constant 0 : i32
    %c0_i32_1 = arith.constant 0 : i32
    return %c0_i32, %c0_i32_0 : i32, i32
  }
  func.func @transform_2(%arg0: i32) -> (i32, i32) {
    %c0_i32 = arith.constant 0 : i32
    %c0_i32_0 = arith.constant 0 : i32
    %c0_i32_1 = arith.constant 0 : i32
    return %c0_i32, %c0_i32_0 : i32, i32
  }
  func.func @transform_3(%arg0: i32) -> (i32, i32) {
    %c0_i32 = arith.constant 0 : i32
    %c0_i32_0 = arith.constant 0 : i32
    %c0_i32_1 = arith.constant 0 : i32
    return %c0_i32, %c0_i32_0 : i32, i32
  }
  func.func @transform_4(%arg0: i32) -> (i32, i32) {
    %c0_i32 = arith.constant 0 : i32
    %c0_i32_0 = arith.constant 0 : i32
    %c0_i32_1 = arith.constant 0 : i32
    return %c0_i32, %c0_i32_0 : i32, i32
  }
  func.func @transform_5(%arg0: i32) -> (i32, i32) {
    %c0_i32 = arith.constant 0 : i32
    %c0_i32_0 = arith.constant 0 : i32
    %c0_i32_1 = arith.constant 0 : i32
    return %c0_i32, %c0_i32_0 : i32, i32
  }
  func.func @transform_6(%arg0: i32) -> (i32, i32) {
    %c0_i32 = arith.constant 0 : i32
    %c0_i32_0 = arith.constant 0 : i32
    return %arg0, %c0_i32 : i32, i32
  }
}

</mosaic_0001>

<bundles_post_ra>
// kernel: tpu_custom_call.1
= control target key start
LH: loop header
LB: loop body
LE: loop exit
PB: predicated region body
PF: predicated region fallthrough
CT: control target
= control target key end

     0   :  { %11 = vsyncpa [#allocation3], 0  ;;  %s3656_s0 = inlined_call_operand.hbm [shape: bf16[16,8,32], index: 0, kind: input, shape index: {}]   ;;  %s3657_s1 = inlined_call_operand.vmem [shape: bf16[128,768], index: 1, kind: input, shape index: {}]   ;;  %s3658_s2 = inlined_call_operand.vmem [shape: f32[1,768], index: 2, kind: input, shape index: {}]   ;;  %s3659_s3 = inlined_call_operand.hbm [shape: f32[8,768], index: 3, kind: input, shape index: {}]   ;;  %s3660_s4 = inlined_call_operand.vmem [shape: bf16[768,4], index: 4, kind: input, shape index: {}]   ;;  %s3661_s5 = inlined_call_operand.vmem [shape: f32[1,4], index: 5, kind: input, shape index: {}]   ;;  %s3662_s6 = inlined_call_operand.vmem [shape: f32[16,4], index: 6, kind: output, shape index: {}]  }
   0x1   :  { %13 = vsyncpa [#allocation3 + $0x1], 0 }
   0x2   :  { %14 = vsyncpa [#allocation5], 0  ;;  %s2742_s21 = smov 0   ;;  %s2744_s22 = smov 0  }
   0x3   :  { %s2746_s23 = smov 0   ;;  %s2748_s24 = smov 0  }
   0x4 LB: > { %s2761_s25 = sadd.s32 4294967295, %s2697_s24   ;;  %s2764_s26 = sadd.s32 1, %s2697_s24   ;;  %s2697_s24 = sphi %s2748_s24, %s3688_s24   ;;  %s2693_s23 = sphi %s2746_s23, %s3687_s23   ;;  %s2689_s22 = sphi %s2744_s22, %s3686_s22   ;;  %s2685_s21 = sphi %s2742_s21, %s3685_s21  }
   0x5   : > { %s24_s27 = ssub.s32 %s2697_s24, %s2764_s26  ;;  %s27_s28 = sadd.s32 1, %s2693_s23 }
   0x6   : > { %p25_p0 = scmp.eq.s32.totalorder %s24_s27, 0  ;;  %p34_p1 = scmp.ne.s32.totalorder %s2693_s23, %s2689_s22 }
   0x7   : > { %p35_p2 = scmp.eq.s32.totalorder %s2697_s24, 0  ;;  %p40_p3 = scmp.ne.s32.totalorder %s2689_s22, %s2685_s21 }
   0x8   : > { %s2774_s29 = scalar_select %p25_p0, %s2693_s23, %s27_s28  }
   0x9   : > { %p2776_p4 = por %p35_p2, %p34_p1  ;;  %p3663_p5 = scmp.eq.s32.totalorder %s2761_s25, 0 }
   0xa   : > { %p2245_p6 = scmp.ge.s32.totalorder %s2697_s24, 1  ;;  %p182_p7 = scmp.lt.s32.totalorder %s2697_s24, 3 }
   0xb   : > { %p2785_p8 = por %p3663_p5, %p40_p3  ;;  %s2699_s9 = smov [#allocation4]  }
   0xc   : > { %p2789_p9 = pnand %p2245_p6, %p182_p7  ;;  %s201_s10 = sshll.u32 %s2699_s9, 4  ;;  %s202_s10 = int_to_ptr.vmem [resolvable:$true] %s201_s10 }
   0xd   : > { %s3668_s7 = scalar_select %p2785_p8, 1, 0 }
   0xe   : > { %s3669_s8 = scalar_select %p2789_p9, 1, 0 }
   0xf   : > { %p2431_p10 = pneg %p2789_p9  ;;  %p2440_p11 = scmp.lt.s32.totalorder %s2697_s24, 2 }
  0x10   : > { %s218_s11 = sand.u32 1, %s2693_s23   ;;  %s2601_s17 = scalar_lea.hbm %s3659_s3, 768 }
  0x11   : > { %p2799_p12 = pnand %p2431_p10, %p3663_p5  ;;  %p2805_p13 = pnand %p2440_p11, %p2776_p4 }
  0x12   : > { %s2248_s14 = sshll.u32 %s218_s11, 5  ;;  %p2602_p0 = scmp.ne.s32.totalorder %s3659_s3, %s2601_s17 }
  0x13   : > { %s3671_s13 = scalar_select %p2805_p13, 1, 0 }
  0x14   : > { %p2603_p1 = pneg %p2799_p12  ;;  %p2608_p4 = scmp.lt.u32.totalorder %s2601_s17, %s3659_s3 }
  0x16   : > { %p2604_p2 = pnand %p2603_p1, %p2602_p0 }
  0x18   : > { %p2605_p3 = pneg %p2604_p2 }
  0x1a   : > { %p2610_p6 = pnand %p2608_p4, %p2605_p3 }
  0x1c   : > { %2613 = shalt.err (!%p2610_p6)
}
  0x1d   : > { %s2614_s27 = scalar_lea.vmem %s202_s10, 768  ;;  %p2622_p5 = scmp.lt.s32.totalorder %s202_s10, %s202_s10 }
  0x1e   : > { %p2615_p7 = scmp.ne.s32.totalorder %s202_s10, %s2614_s27  ;;  %p2623_p8 = scmp.lt.s32.totalorder %s2614_s27, %s2614_s27 }
  0x20   : > { %p2617_p10 = pnand %p2615_p7, %p2603_p1  ;;  %p2624_p9 = por %p2623_p8, %p2622_p5 }
  0x22   : > { %p2618_p11 = pneg %p2617_p10 }
  0x24   : > { %p2625_p13 = pnand %p2624_p9, %p2618_p11 }
  0x26   : > { %2628 = shalt.err (!%p2625_p13)
}
  0x27   : > { %2434 = dma.hbm_to_vmem [thread:$0]  (!%p2799_p12), %s3659_s3, 768, %s202_s10, [#allocation5]  }
  0x28   : > { %s2358_s9 = sshll.u32 %s2697_s24, 9  ;;  %s222_s18 = scalar_lea.vmem [#allocation2], %s2248_s14 }
  0x29   : > { %s2829_s17 = scalar_lea.hbm %s3656_s0, %s2358_s9  ;;  %s229_s19 = sshll.u32 %s222_s18, 4  ;;  %s2831_s19 = int_to_ptr.vmem [resolvable:$true] %s229_s19 }
  0x2a   : > { %s2833_s12 = scalar_lea.sflag [#allocation3], %s218_s11  ;;  %s2629_s20 = scalar_lea.hbm %s2829_s17, 512 }
  0x2b   : > { %p2630_p5 = scmp.ne.s32.totalorder %s2829_s17, %s2629_s20  ;;  %p3672_p8 = scmp.ne.s32.totalorder %s3671_s13, 0 }
  0x2c   : > { %s2634_s21 = scalar_lea.hbm %s3656_s0, 1024  ;;  %p2635_p0 = scmp.lt.u32.totalorder %s2829_s17, %s3656_s0 }
  0x2d   : > { %p2631_p9 = pneg %p3672_p8  ;;  %p2636_p1 = scmp.lt.u32.totalorder %s2634_s21, %s2629_s20 }
  0x2e   : > { %p2638_p3 = scmp.lt.u32.totalorder %s2629_s20, %s2829_s17 }
  0x2f   : > { %p2632_p12 = pnand %p2631_p9, %p2630_p5  ;;  %p2637_p2 = por %p2636_p1, %p2635_p0 }
  0x31   : > { %p2633_p13 = pneg %p2632_p12  ;;  %p2639_p4 = por %p2638_p3, %p2637_p2 }
  0x33   : > { %p2640_p6 = pnand %p2639_p4, %p2633_p13 }
  0x35   : > { %2643 = shalt.err (!%p2640_p6)
}
  0x36   : > { %s2644_s11 = scalar_lea.vmem %s2831_s19, 512  ;;  %s2700_s14 = smov [#allocation2]  }
  0x37   : > { %p2645_p7 = scmp.ne.s32.totalorder %s2831_s19, %s2644_s11  ;;  %s2649_s30 = sshll.u32 %s2700_s14, 4  ;;  %s2650_s30 = int_to_ptr.vmem [resolvable:$false] %s2649_s30 }
  0x38   : > { %s2651_s9 = scalar_lea.vmem %s2650_s30, 1024  ;;  %p2652_p5 = scmp.lt.s32.totalorder %s2831_s19, %s2650_s30 }
  0x39   : > { %p2647_p10 = pnand %p2645_p7, %p2631_p9  ;;  %p2653_p12 = scmp.lt.s32.totalorder %s2651_s9, %s2644_s11 }
  0x3b   : > { %p2648_p11 = pneg %p2647_p10  ;;  %p2654_p0 = por %p2653_p12, %p2652_p5 }
  0x3d   : > { %p2655_p1 = pnand %p2654_p0, %p2648_p11 }
  0x3f   : > { %2658 = shalt.err (!%p2655_p1)
}
  0x40   : > { %s2701_s15 = smov 64   ;;  %s2702_s16 = smov 4  }
  0x41   : > { %2438 = dma.hbm_to_vmem [thread:$0]  (!%p3672_p8), %s2829_s17, 512, %s2831_s19, %s2833_s12, %s2701_s15, %s2701_s15, %s2702_s16  }
  0x42   : > { %p3673_p9 = scmp.ne.s32.totalorder %s3669_s8, 0 }
  0x44   : > { %241 = sbr.rel (%p3673_p9) target bundleno = 807 (0x327), region = 44 }
  0x4b   : > { %s243_s18 = sand.u32 1, %s2689_s22   ;;  %p3674_p13 = scmp.ne.s32.totalorder %s3668_s7, 0 }
  0x4c   : > { %s2252_s20 = sshll.u32 %s243_s18, 5  ;;  %s244_s24 = scalar_lea.sflag [#allocation3], %s243_s18 }
  0x4d   : > { %s2864_s10 = scalar_lea.vmem [#allocation2], %s2252_s20 }
  0x4e   : > { %2676 = dma.done.wait (%p3674_p13), %s244_s24, 512  }
  0x4f   : > { %2678 = vsyncadd (%p3674_p13), %s244_s24, 4294966784  ;;  %p3675_p2 = scmp.eq.s32.totalorder %s2761_s25, 0 }
  0x51   : > { %2680 = dma.done.wait (%p3675_p2), [#allocation5], 768   ;;  %p3676_p8 = pmov %p3675_p2 }
  0x52   : > { %vm293_vm0 = vcmask 1043456   ;;  %v285_v0 = vld [vmem:[%s2864_s10] sm:$0xf]  ;;  %v286_v1 = vld [vmem:[%s2864_s10 + $0x4] sm:$0xf]  ;;  %s2703_s7 = smov 64  }
  0x53   : > { %2682 = vsyncadd (%p3676_p8), [#allocation5], 4294966528  ;;  %v288_v2 = vld [vmem:[%s2864_s10 + $0xc] sm:$0xf]  ;;  %v2878_v3 = vsel %vm293_vm0, %v285_v0, 0  ;;  %v2881_v4 = vsel %vm293_vm0, %v286_v1, 0 }
  0x54   : > { %v2884_v5 = vsel %vm293_vm0, %v288_v2, 0  ;;  %v383_v6 = vrot.slane %v2878_v3, 1  ;;  %v311_v7 = vshrl.u32 %v2878_v3, 16  ;;  %v313_v8 = vshll.u32 %v2878_v3, 16  ;;  %v287_v11 = vld [vmem:[%s2864_s10 + $0x8] sm:$0xf] }
  0x55   : > { %v317_v9 = vshrl.u32 %v2881_v4, 16  ;;  %v319_v10 = vshll.u32 %v2881_v4, 16  ;;  %v384_v12 = vrot.slane %v2881_v4, 1  ;;  %v331_v14 = vshll.u32 %v2884_v5, 16  ;;  %v2481_v22 = vld [vmem:[%s3657_s1 + $0x4] ss:$24 sps:$4 sm:$0xff]  }
  0x56   : > { %391 = vrot.lane.b32.xlu1 %v383_v6, %s2703_s7  ;;  %v315_v13 = vrot.slane %v313_v8, 1  ;;  %v329_v18 = vshrl.u32 %v2884_v5, 16  ;;  %v407_v20 = vrot.slane %v311_v7, 1  ;;  %v2897_v21 = vsel %vm293_vm0, %v287_v11, 0  ;;  %v2483_v24 = vld [vmem:[%s3657_s1 + $0xc] ss:$24 sps:$4 sm:$0xff]   ;;  %842 = vmatprep.subr.bf16.mxu0 %v2481_v22 }
  0x57   : > { %v410_v15 = vrot.slane %v317_v9, 1  ;;  %v411_v16 = vrot.slane %v319_v10, 2  ;;  %v321_v17 = vrot.slane %v319_v10, 1  ;;  %v408_v23 = vrot.slane %v313_v8, 2  ;;  %v2485_v25 = vld [vmem:[%s3657_s1] ss:$24 sps:$4 sm:$0xff]   ;;  %915 = vmatprep.subr.bf16.mxu1 %v2483_v24 }
  0x58   : > { %v316_v19 = vor.u32 %v315_v13, %v311_v7  ;;  %s2704_s27 = smov 32   ;;  %v333_v28 = vrot.slane %v331_v14, 1  ;;  %v325_v29 = vshll.u32 %v2897_v21, 16  ;;  %v2486_v30 = vld [vmem:[%s3657_s1 + $0x8] ss:$24 sps:$4 sm:$0xff]   ;;  %843 = vmatpush1.bf16.msra.mxu0 %v2485_v25  ;;  %s2705_s9 = smov 96  }
  0x59   : > { %v412_v26 = vor.u32 %v411_v16, %v410_v15  ;;  %v322_v27 = vor.u32 %v321_v17, %v317_v9  ;;  %v290_v31 = vld [vmem:[%s2864_s10 + $0x14] sm:$0xf]  ;;  %916 = vmatpush1.bf16.msra.mxu1 %v2486_v30  ;;  %v409_v34 = vor.u32 %v408_v23, %v407_v20  ;;  %v323_v35 = vshrl.u32 %v2897_v21, 16  ;;  %v2491_v38 = vld [vmem:[%s3657_s1 + $0x30] ss:$24 sps:$4 sm:$0xff]   ;;  %p280_p3 = scmp.lt.s32.totalorder %s2761_s25, 1 }
  0x5a   : > { %393 = vrot.lane.b32.xlu1 %v384_v12, %s2703_s7  ;;  %359 = vrot.lane.b32.xlu0 %v316_v19, %s2704_s27  ;;  %v2487_v32 = vld [vmem:[%s3657_s1 + $0x34] ss:$24 sps:$4 sm:$0xff]   ;;  %v334_v33 = vor.u32 %v333_v28, %v329_v18  ;;  %v327_v36 = vrot.slane %v325_v29, 1  ;;  %v2928_v39 = vsel %vm293_vm0, %v290_v31, 0  ;;  %v2492_v40 = vld [vmem:[%s3657_s1 + $0x38] ss:$24 sps:$4 sm:$0xff]  }
  0x5b   : > { %v2489_v37 = vld [vmem:[%s3657_s1 + $0x3c] ss:$24 sps:$4 sm:$0xff]   ;;  %844 = vmatprep.subr.bf16.mxu0 %v2487_v32  ;;  %v289_v41 = vld [vmem:[%s2864_s10 + $0x10] sm:$0xf]  ;;  %v416_v43 = vrot.slane %v329_v18, 1  ;;  %v417_v44 = vrot.slane %v331_v14, 2 }
  0x5c   : > { %917 = vmatprep.subr.bf16.mxu1 %v2489_v37  ;;  %845 = vmatpush1.bf16.msra.mxu0 %v2491_v38  ;;  %v2493_v42 = vld [vmem:[%s3657_s1 + $0x64] ss:$24 sps:$4 sm:$0xff]   ;;  %v386_v46 = vrot.slane %v2884_v5, 1  ;;  %v328_v47 = vor.u32 %v327_v36, %v323_v35  ;;  %v343_v48 = vshll.u32 %v2928_v39, 16  ;;  %v2497_v49 = vld [vmem:[%s3657_s1 + $0x60] ss:$24 sps:$4 sm:$0xff]  }
  0x5d   : > { %918 = vmatpush1.bf16.msra.mxu1 %v2492_v40  ;;  %v2495_v45 = vld [vmem:[%s3657_s1 + $0x6c] ss:$24 sps:$4 sm:$0xff]   ;;  %v2948_v50 = vsel %vm293_vm0, %v289_v41, 0  ;;  %846 = vmatprep.subr.bf16.mxu0 %v2493_v42  ;;  %v2498_v51 = vld [vmem:[%s3657_s1 + $0x68] ss:$24 sps:$4 sm:$0xff]   ;;  %v385_v52 = vrot.slane %v2897_v21, 1  ;;  %v418_v56 = vor.u32 %v417_v44, %v416_v43 }
  0x5e   : > { %433 = vrot.lane.b32.xlu1 %v412_v26, %s2705_s9  ;;  %361 = vrot.lane.b32.xlu0 %v322_v27, %s2704_s27  ;;  %v341_v53 = vshrl.u32 %v2928_v39, 16  ;;  %v413_v54 = vrot.slane %v323_v35, 1  ;;  %v2499_v55 = vld [vmem:[%s3657_s1 + $0x94] ss:$24 sps:$4 sm:$0xff]   ;;  %v2503_v58 = vld [vmem:[%s3657_s1 + $0x90] ss:$24 sps:$4 sm:$0xff]  }
  0x5f   : > { %919 = vmatprep.subr.bf16.mxu1 %v2495_v45  ;;  %v2501_v57 = vld [vmem:[%s3657_s1 + $0x9c] ss:$24 sps:$4 sm:$0xff]   ;;  %v2504_v59 = vld [vmem:[%s3657_s1 + $0x98] ss:$24 sps:$4 sm:$0xff]   ;;  %v345_v60 = vrot.slane %v343_v48, 1  ;;  %v414_v61 = vrot.slane %v325_v29, 2 }
  0x60   : > { %847 = vmatpush1.bf16.msra.mxu0 %v2497_v49  ;;  %v337_v62 = vshll.u32 %v2948_v50, 16  ;;  %v292_v63 = vld [vmem:[%s2864_s10 + $0x1c] sm:$0xf]  ;;  %v2507_v1 = vld [vmem:[%s3657_s1 + $0xcc] ss:$24 sps:$4 sm:$0xff]   ;;  %v2706_v7 = vmov 0  }
  0x61   : > { %920 = vmatpush1.bf16.msra.mxu1 %v2498_v51  ;;  %848 = vmatprep.subr.bf16.mxu0 %v2499_v55  ;;  %v2505_v0 = vld [vmem:[%s3657_s1 + $0xc4] ss:$24 sps:$4 sm:$0xff]   ;;  %v2509_v2 = vld [vmem:[%s3657_s1 + $0xc0] ss:$24 sps:$4 sm:$0xff]   ;;  %v2511_v8 = vld [vmem:[%s3657_s1 + $0xf4] ss:$24 sps:$4 sm:$0xff]   ;;  %v346_v9 = vor.u32 %v345_v60, %v341_v53  ;;  %v415_v10 = vor.u32 %v414_v61, %v413_v54 }
  0x62   : > { %365 = vrot.lane.b32.xlu1 %v334_v33, %s2704_s27  ;;  %431 = vrot.lane.b32.xlu0 %v409_v34, %s2705_s9  ;;  %v2510_v6 = vld [vmem:[%s3657_s1 + $0xc8] ss:$24 sps:$4 sm:$0xff]   ;;  %v335_v11 = vshrl.u32 %v2948_v50, 16  ;;  %v339_v12 = vrot.slane %v337_v62, 1  ;;  %v291_v13 = vld [vmem:[%s2864_s10 + $0x18] sm:$0xf] }
  0x63   : > { %921 = vmatprep.subr.bf16.mxu1 %v2501_v57  ;;  %874 = vmatprep.mubr.bf16.mxu0 %v2706_v7  ;;  %v2992_v14 = vsel %vm293_vm0, %v292_v63, 0  ;;  %v2513_v15 = vld [vmem:[%s3657_s1 + $0xfc] ss:$24 sps:$4 sm:$0xff]   ;;  %v2515_v16 = vld [vmem:[%s3657_s1 + $0xf0] ss:$24 sps:$4 sm:$0xff]   ;;  %v422_v18 = vrot.slane %v341_v53, 1 }
  0x64   : > { %849 = vmatpush1.bf16.msra.mxu0 %v2503_v58  ;;  %947 = vmatprep.mubr.bf16.mxu1 %v2706_v7  ;;  %v2516_v17 = vld [vmem:[%s3657_s1 + $0xf8] ss:$24 sps:$4 sm:$0xff]   ;;  %v423_v19 = vrot.slane %v343_v48, 2  ;;  %v2517_v20 = vld [vmem:[%s3657_s1 + $0x124] ss:$24 sps:$4 sm:$0xff]   ;;  %v388_v22 = vrot.slane %v2928_v39, 1  ;;  %v340_v23 = vor.u32 %v339_v12, %v335_v11 }
  0x65   : > { %922 = vmatpush1.bf16.msra.mxu1 %v2504_v59  ;;  %850 = vmatprep.subr.bf16.mxu0 %v2505_v0  ;;  %v355_v24 = vshll.u32 %v2992_v14, 16  ;;  %v3012_v25 = vsel %vm293_vm0, %v291_v13, 0  ;;  %v2519_v26 = vld [vmem:[%s3657_s1 + $0x12c] ss:$24 sps:$4 sm:$0xff]   ;;  %v387_v27 = vrot.slane %v2948_v50, 1  ;;  %v419_v30 = vrot.slane %v335_v11, 1 }
  0x66   : > { %397 = vrot.lane.b32.xlu1 %v386_v46, %s2703_s7  ;;  %363 = vrot.lane.b32.xlu0 %v328_v47, %s2704_s27  ;;  %v2521_v28 = vld [vmem:[%s3657_s1 + $0x120] ss:$24 sps:$4 sm:$0xff]   ;;  %v424_v29 = vor.u32 %v423_v19, %v422_v18  ;;  %v2523_v32 = vld [vmem:[%s3657_s1 + $0x154] ss:$24 sps:$4 sm:$0xff]   ;;  %v353_v33 = vshrl.u32 %v2992_v14, 16  ;;  %v420_v35 = vrot.slane %v337_v62, 2 }
  0x67   : > { %923 = vmatprep.subr.bf16.mxu1 %v2507_v1  ;;  %v2522_v31 = vld [vmem:[%s3657_s1 + $0x128] ss:$24 sps:$4 sm:$0xff]   ;;  %v357_v34 = vrot.slane %v355_v24, 1  ;;  %v349_v36 = vshll.u32 %v3012_v25, 16  ;;  %v2525_v37 = vld [vmem:[%s3657_s1 + $0x15c] ss:$24 sps:$4 sm:$0xff]  }
  0x68   : > { %851 = vmatpush1.bf16.msra.mxu0 %v2509_v2  ;;  %v2527_v38 = vld [vmem:[%s3657_s1 + $0x150] ss:$24 sps:$4 sm:$0xff]   ;;  %v2531_v41 = vld [vmem:[%s3657_s1 + $0x14] ss:$24 sps:$4 sm:$0xff]   ;;  %v421_v43 = vor.u32 %v420_v35, %v419_v30  ;;  %v347_v44 = vshrl.u32 %v3012_v25, 16  ;;  %v390_v46 = vrot.slane %v2992_v14, 1 }
  0x69   : > { %924 = vmatpush1.bf16.msra.mxu1 %v2510_v6  ;;  %852 = vmatprep.subr.bf16.mxu0 %v2511_v8  ;;  %v2528_v40 = vld [vmem:[%s3657_s1 + $0x158] ss:$24 sps:$4 sm:$0xff]   ;;  %v358_v42 = vor.u32 %v357_v34, %v353_v33  ;;  %v351_v45 = vrot.slane %v349_v36, 1  ;;  %v428_v48 = vrot.slane %v353_v33, 1  ;;  %v429_v49 = vrot.slane %v355_v24, 2  ;;  %s3690_s25 = smov (!%p280_p3, %s2761_s25), 1 }
  0x6a   : > { %437 = vrot.lane.b32.xlu1 %v418_v56, %s2705_s9  ;;  %395 = vrot.lane.b32.xlu0 %v385_v52, %s2703_s7  ;;  %v389_v51 = vrot.slane %v3012_v25, 1  ;;  %v425_v53 = vrot.slane %v347_v44, 1  ;;  %v426_v54 = vrot.slane %v349_v36, 2  ;;  %vm447_vm1 = vcmask 261120   ;;  %v2532_v12 = vld [vmem:[%s3657_s1 + $0x40] ss:$24 sps:$4 sm:$0xff]  }
  0x6b   : > { %925 = vmatprep.subr.bf16.mxu1 %v2513_v15  ;;  %v352_v47 = vor.u32 %v351_v45, %v347_v44  ;;  %v430_v52 = vor.u32 %v429_v49, %v428_v48  ;;  %vm464_vm2 = vcmask 523264   ;;  %vm481_vm3 = vcmask 785408   ;;  %v2537_v13 = vld [vmem:[%s3657_s1 + $0x74] ss:$24 sps:$4 sm:$0xff]   ;;  %v2535_v18 = vld [vmem:[%s3657_s1 + $0x70] ss:$24 sps:$4 sm:$0xff]  }
  0x6c   : > { %853 = vmatpush1.bf16.msra.mxu0 %v2515_v16  ;;  %v427_v55 = vor.u32 %v426_v54, %v425_v53  ;;  %v2546_v33 = vld [vmem:[%s3657_s1 + $0x104] ss:$24 sps:$4 sm:$0xff]   ;;  %vm1698_vm4 = vcmask 1041409   ;;  %vm1700_vm5 = vcmask 1042434   ;;  %vm1702_vm6 = vcmask 1043459   ;;  %s2254_s17 = sshll.u32 %s3690_s25, 3 }
  0x6d   : > { %926 = vmatpush1.bf16.msra.mxu1 %v2516_v17  ;;  %854 = vmatprep.subr.bf16.mxu0 %v2517_v20  ;;  %v2540_v20 = vld [vmem:[%s3657_s1 + $0xa4] ss:$24 sps:$4 sm:$0xff]   ;;  %vm1704_vm7 = vcmask 1044484   ;;  %vm1706_vm8 = vcmask 1045509   ;;  %vm1708_vm9 = vcmask 1046534   ;;  %vm1710_vm10 = vcmask 1047559  }
  0x6e   : > { %369 = vrot.lane.b32.xlu1 %v346_v9, %s2704_s27  ;;  %435 = vrot.lane.b32.xlu0 %v415_v10, %s2705_s9  ;;  %vm2167_vm11 = vcmask 31744  }
  0x6f   : > { %927 = vmatprep.subr.bf16.mxu1 %v2519_v26 }
  0x70   : > { %855 = vmatpush1.bf16.msra.mxu0 %v2521_v28 }
  0x71   : > { %928 = vmatpush1.bf16.msra.mxu1 %v2522_v31  ;;  %856 = vmatprep.subr.bf16.mxu0 %v2523_v32  ;;  %v2541_v32 = vld [vmem:[%s3657_s1 + $0xd0] ss:$24 sps:$4 sm:$0xff]  }
  0x72   : > { %401 = vrot.lane.b32.xlu1 %v388_v22, %s2703_s7  ;;  %367 = vrot.lane.b32.xlu0 %v340_v23, %s2704_s27 }
  0x73   : > { %929 = vmatprep.subr.bf16.mxu1 %v2525_v37  ;;  %v2544_v37 = vld [vmem:[%s3657_s1 + $0x100] ss:$24 sps:$4 sm:$0xff]  }
  0x74   : > { %857 = vmatpush1.bf16.msra.mxu0 %v2527_v38 }
  0x75   : > { %930 = vmatpush1.bf16.msra.mxu1 %v2528_v40  ;;  %988 = vmatprep.subr.bf16.mxu0 %v2531_v41  ;;  %v2549_v40 = vld [vmem:[%s3657_s1 + $0x134] ss:$24 sps:$4 sm:$0xff]  }
  0x76   : > { %441 = vrot.lane.b32.xlu1 %v424_v29, %s2705_s9  ;;  %399 = vrot.lane.b32.xlu0 %v387_v27, %s2703_s7  ;;  %v2543_v29 = vld [vmem:[%s3657_s1 + $0xd4] ss:$24 sps:$4 sm:$0xff]  }
  0x7a   : > { %373 = vrot.lane.b32.xlu1 %v358_v42, %s2704_s27  ;;  %439 = vrot.lane.b32.xlu0 %v421_v43, %s2705_s9 }
  0x7e   : > { %405 = vrot.lane.b32.xlu1 %v390_v46, %s2703_s7  ;;  %371 = vrot.lane.b32.xlu0 %v352_v47, %s2704_s27  ;;  %v2552_v47 = vld [vmem:[%s3657_s1 + $0x164] ss:$24 sps:$4 sm:$0xff]  }
  0x82   : > { %445 = vrot.lane.b32.xlu1 %v430_v52, %s2705_s9  ;;  %403 = vrot.lane.b32.xlu0 %v389_v51, %s2703_s7  ;;  %v2550_v51 = vld [vmem:[%s3657_s1 + $0x160] ss:$24 sps:$4 sm:$0xff]   ;;  %s283_s7 = scalar_lea.vmem %s3662_s6, %s2254_s17 }
  0x86   : > { %443 = vrot.lane.b32.xlu0 %v427_v55, %s2705_s9 }
  0xc8   : > { %v392_v56 = vpop.permute.xlu1 %391 }
  0xcc   : > { %v394_v57 = vpop.permute.xlu1 %393  ;;  %v360_v58 = vpop.permute.xlu0 %359 }
  0xcd   : > { %v449_v61 = vsel %vm447_vm1, %v2878_v3, %v360_v58  ;;  %v2529_v3 = vld [vmem:[%s3657_s1 + $0x10] ss:$24 sps:$4 sm:$0xff]  }
  0xce   : > { %v466_v1 = vsel %vm464_vm2, %v449_v61, %v392_v56 }
  0xd0   : > { %v434_v59 = vpop.permute.xlu1 %433  ;;  %v362_v60 = vpop.permute.xlu0 %361 }
  0xd1   : > { %v451_v62 = vsel %vm447_vm1, %v2881_v4, %v362_v60  ;;  %v2534_v4 = vld [vmem:[%s3657_s1 + $0x44] ss:$24 sps:$4 sm:$0xff]  }
  0xd2   : > { %v468_v63 = vsel %vm464_vm2, %v451_v62, %v394_v57  ;;  %v2555_v62 = vld [vmem:[%s3660_s4] sm:$0xff]  }
  0xd3   : > { %v485_v6 = vsel %vm481_vm3, %v468_v63, %v434_v59  ;;  %v2556_v63 = vld [vmem:[%s3660_s4 + $0x80] sm:$0xff]  }
  0xd4   : > { %v366_v0 = vpop.permute.xlu1 %365  ;;  %v432_v2 = vpop.permute.xlu0 %431 }
  0xd5   : > { %v483_v8 = vsel %vm481_vm3, %v466_v1, %v432_v2  ;;  %v455_v17 = vsel %vm447_vm1, %v2884_v5, %v366_v0  ;;  %v2558_v0 = vld [vmem:[%s3660_s4 + $0xc8] sm:$0xff]  }
  0xd6   : > { %v3063_v9 = vcombine.low %v483_v8, %v485_v6  ;;  %v2559_v1 = vld [vmem:[%s3660_s4 + $0x8] sm:$0xff]   ;;  %v2561_v6 = vld [vmem:[%s3660_s4 + $0x50] sm:$0xff]  }
  0xd7   : > { %v2560_v2 = vld [vmem:[%s3660_s4 + $0x88] sm:$0xff]   ;;  %v2562_v8 = vld [vmem:[%s3660_s4 + $0xd0] sm:$0xff]  }
  0xd8   : > { %v398_v10 = vpop.permute.xlu1 %397  ;;  %875 = vmatmul.mubr.bf16.vlgmr.msra.gmra.mrb[0].mxu0 %v3063_v9  ;;  %948 = vmatmul.mubr.bf16.vlgmr.msra.gmra.mrb[0].mxu1 %v3063_v9  ;;  %v364_v11 = vpop.permute.xlu0 %363 }
  0xd9   : > { %884 = vmatprep.mubr.bf16.mxu0 %v2706_v7  ;;  %957 = vmatprep.mubr.bf16.mxu1 %v2706_v7  ;;  %v453_v19 = vsel %vm447_vm1, %v2897_v21, %v364_v11  ;;  %v472_v22 = vsel %vm464_vm2, %v455_v17, %v398_v10  ;;  %v2538_v21 = vld [vmem:[%s3657_s1 + $0xa0] ss:$24 sps:$4 sm:$0xff]  }
  0xda   : > { %989 = vmatpush1.bf16.msra.mxu0 %v2529_v3  ;;  %v2564_v3 = vld [vmem:[%s3660_s4 + $0x90] sm:$0xff]   ;;  %v2566_v10 = vld [vmem:[%s3660_s4 + $0xd8] sm:$0xff]   ;;  %v2572_v17 = vld [vmem:[%s3660_s4 + $0xa0] sm:$0xff]  }
  0xdb   : > { %990 = vmatprep.subr.bf16.mxu0 %v2534_v4  ;;  %v2565_v4 = vld [vmem:[%s3660_s4 + $0x58] sm:$0xff]  }
  0xdc   : > { %v438_v15 = vpop.permute.xlu1 %437  ;;  %v396_v16 = vpop.permute.xlu0 %395  ;;  %v2567_v11 = vld [vmem:[%s3660_s4 + $0x18] sm:$0xff]  }
  0xdd   : > { %v470_v23 = vsel %vm464_vm2, %v453_v19, %v396_v16  ;;  %v489_v5 = vsel %vm481_vm3, %v472_v22, %v438_v15  ;;  %v2570_v15 = vld [vmem:[%s3660_s4 + $0xe0] sm:$0xff]   ;;  %v2574_v19 = vld [vmem:[%s3660_s4 + $0xe8] sm:$0xff]  }
  0xde   : > { %991 = vmatpush1.bf16.msra.mxu0 %v2532_v12  ;;  %v2568_v12 = vld [vmem:[%s3660_s4 + $0x98] sm:$0xff]   ;;  %v2571_v16 = vld [vmem:[%s3660_s4 + $0x20] sm:$0xff]   ;;  %v2576_v22 = vld [vmem:[%s3660_s4 + $0xa8] sm:$0xff]  }
  0xdf   : > { %992 = vmatprep.subr.bf16.mxu0 %v2537_v13  ;;  %v2569_v13 = vld [vmem:[%s3660_s4 + $0x60] sm:$0xff]  }
  0xe0   : > { %v370_v24 = vpop.permute.xlu1 %369  ;;  %v436_v26 = vpop.permute.xlu0 %435 }
  0xe1   : > { %v487_v27 = vsel %vm481_vm3, %v470_v23, %v436_v26  ;;  %v459_v36 = vsel %vm447_vm1, %v2928_v39, %v370_v24  ;;  %v2577_v23 = vld [vmem:[%s3660_s4 + $0x70] sm:$0xff]  }
  0xe2   : > { %v2256_v28 = vcombine.low %v487_v27, %v489_v5  ;;  %993 = vmatpush1.bf16.msra.mxu0 %v2535_v18  ;;  %v2573_v18 = vld [vmem:[%s3660_s4 + $0x68] sm:$0xff]   ;;  %v2578_v24 = vld [vmem:[%s3660_s4 + $0xf0] sm:$0xff]   ;;  %v548_v27 = vlaneseq }
  0xe3   : > { %994 = vmatprep.subr.bf16.mxu0 %v2540_v20  ;;  %v2575_v20 = vld [vmem:[%s3660_s4 + $0x28] sm:$0xff]   ;;  %v2579_v26 = vld [vmem:[%s3660_s4 + $0x30] sm:$0xff]  }
  0xe4   : > { %v402_v30 = vpop.permute.xlu1 %401  ;;  %885 = vmatmul.mubr.bf16.gmra.mrb[4].mxu0 %v2256_v28  ;;  %958 = vmatmul.mubr.bf16.gmra.mrb[4].mxu1 %v2256_v28  ;;  %v368_v31 = vpop.permute.xlu0 %367  ;;  %v2580_v5 = vld [vmem:[%s3660_s4 + $0xb0] sm:$0xff]  }
  0xe5   : > { %894 = vmatprep.mubr.bf16.mxu0 %v2706_v7  ;;  %967 = vmatprep.mubr.bf16.mxu1 %v2706_v7  ;;  %v457_v38 = vsel %vm447_vm1, %v2948_v50, %v368_v31  ;;  %v476_v41 = vsel %vm464_vm2, %v459_v36, %v402_v30  ;;  %v2547_v50 = vld [vmem:[%s3657_s1 + $0x130] ss:$24 sps:$4 sm:$0xff]   ;;  %v2584_v30 = vld [vmem:[%s3660_s4 + $0xb8] sm:$0xff]   ;;  %v549_v31 = vshrl.u32 %v548_v27, 7 }
  0xe6   : > { %995 = vmatpush1.bf16.msra.mxu0 %v2538_v21  ;;  %v2582_v21 = vld [vmem:[%s3660_s4 + $0xf8] sm:$0xff]  }
  0xe7   : > { %996 = vmatprep.subr.bf16.mxu0 %v2543_v29  ;;  %v2583_v29 = vld [vmem:[%s3660_s4 + $0x38] sm:$0xff]   ;;  %v562_v36 = vsub.s32 3, %v549_v31 }
  0xe8   : > { %v442_v34 = vpop.permute.xlu1 %441  ;;  %v400_v35 = vpop.permute.xlu0 %399 }
  0xe9   : > { %v474_v42 = vsel %vm464_vm2, %v457_v38, %v400_v35  ;;  %v493_v39 = vsel %vm481_vm3, %v476_v41, %v442_v34  ;;  %v546_v34 = vld [vmem:[%s3658_s2] sm:$0x3f]  ;;  %v554_v35 = vsub.s32 1, %v549_v31 }
  0xea   : > { %997 = vmatpush1.bf16.msra.mxu0 %v2541_v32  ;;  %v550_v32 = vsub.s32 0, %v549_v31  ;;  %v3252_v41 = vrot.slane %v546_v34, %v562_v36 }
  0xeb   : > { %998 = vmatprep.subr.bf16.mxu0 %v2546_v33  ;;  %v558_v33 = vsub.s32 2, %v549_v31 }
  0xec   : > { %v374_v43 = vpop.permute.xlu1 %373  ;;  %v440_v44 = vpop.permute.xlu0 %439 }
  0xed   : > { %v491_v45 = vsel %vm481_vm3, %v474_v42, %v440_v44  ;;  %v463_v53 = vsel %vm447_vm1, %v2992_v14, %v374_v43  ;;  %v2553_v14 = vld [vmem:[%s3660_s4 + $0x40] sm:$0xff]   ;;  %v3248_v38 = vrot.slane %v546_v34, %v558_v33  ;;  %v566_v42 = vsub.s32 4, %v549_v31 }
  0xee   : > { %v2257_v46 = vcombine.low %v491_v45, %v493_v39  ;;  %999 = vmatpush1.bf16.msra.mxu0 %v2544_v37  ;;  %2359 = vmatprep.subr.bf16.mxu1 %v2553_v14  ;;  %v3246_v37 = vrot.slane %v546_v34, %v550_v32  ;;  %v570_v43 = vsub.s32 5, %v549_v31 }
  0xef   : > { %1000 = vmatprep.subr.bf16.mxu0 %v2549_v40  ;;  %2360 = vmatpush3.bf16.msra.mxu1 %v2555_v62  ;;  %v3250_v40 = vrot.slane %v546_v34, %v554_v35 }
  0xf0   : > { %v406_v48 = vpop.permute.xlu1 %405  ;;  %895 = vmatmul.mubr.bf16.gmra.mrb[8].mxu0 %v2257_v46  ;;  %968 = vmatmul.mubr.bf16.gmra.mrb[8].mxu1 %v2257_v46  ;;  %v372_v49 = vpop.permute.xlu0 %371 }
  0xf1   : > { %904 = vmatprep.mubr.bf16.mxu0 %v2706_v7  ;;  %977 = vmatprep.mubr.bf16.mxu1 %v2706_v7  ;;  %v461_v55 = vsel %vm447_vm1, %v3012_v25, %v372_v49  ;;  %v480_v56 = vsel %vm464_vm2, %v463_v53, %v406_v48  ;;  %v2554_v25 = vld [vmem:[%s3660_s4 + $0xc0] sm:$0xff]   ;;  %v3258_v49 = vld [vmem:[#allocation4 + $0x10] sm:$0xff] }
  0xf2   : > { %1001 = vmatpush1.bf16.msra.mxu0 %v2547_v50  ;;  %v3256_v48 = vld [vmem:[#allocation4] sm:$0xff] }
  0xf3   : > { %1002 = vmatprep.subr.bf16.mxu0 %v2552_v47 }
  0xf4   : > { %v404_v52 = vpop.permute.xlu0 %403  ;;  %v446_v54 = vpop.permute.xlu1 %445 }
  0xf5   : > { %v478_v57 = vsel %vm464_vm2, %v461_v55, %v404_v52  ;;  %v497_v59 = vsel %vm481_vm3, %v480_v56, %v446_v54  ;;  %v3262_v55 = vrot.slane %v546_v34, %v566_v42  ;;  %v3264_v56 = vrot.slane %v546_v34, %v570_v43 }
  0xf6   : > { %1003 = vmatpush1.bf16.msra.mxu0 %v2550_v51 }
  0xf7   : > { %2381 = vmatprep.subr.bf16.mxu0 %v2554_v25 }
  0xf8   : > { %v444_v58 = vpop.permute.xlu0 %443 }
  0xf9   : > { %v495_v60 = vsel %vm481_vm3, %v478_v57, %v444_v58 }
  0xfa   : > { %v2258_v61 = vcombine.low %v495_v60, %v497_v59  ;;  %v3266_v59 = vld [vmem:[#allocation4 + $0x8] sm:$0xff]  ;;  %v3268_v60 = vld [vmem:[#allocation4 + $0x18] sm:$0xff] }
  0xfc   : > { %905 = vmatmul.mubr.bf16.gmra.mrb[12].mxu0 %v2258_v61  ;;  %978 = vmatmul.mubr.bf16.gmra.mrb[12].mxu1 %v2258_v61 }
  0xfd   : > { %1020 = vmatprep.mubr.bf16.mxu0 %v2706_v7 }
 0x104   : > { %1021 = vmatmul.mubr.bf16.vlgmr.msra.gmra.mrb[16].mxu0 %v3063_v9  ;;  %v2563_v9 = vld [vmem:[%s3660_s4 + $0x10] sm:$0xff]  }
 0x105   : > { %1030 = vmatprep.mubr.bf16.mxu0 %v2706_v7  ;;  %2382 = vmatpush3.bf16.msra.mxu0 %v2556_v63 }
 0x106   : > { %2383 = vmatprep.subr.bf16.mxu0 %v2558_v0 }
 0x109   : > { %2384 = vmatpush3.bf16.msra.mxu0 %v2560_v2 }
 0x10a   : > { %2385 = vmatprep.subr.bf16.mxu0 %v2562_v8 }
 0x10c   : > { %1031 = vmatmul.mubr.bf16.gmra.mrb[20].mxu0 %v2256_v28  ;;  %v2581_v28 = vld [vmem:[%s3660_s4 + $0x78] sm:$0xff]  }
 0x10d   : > { %1040 = vmatprep.mubr.bf16.mxu0 %v2706_v7  ;;  %2386 = vmatpush3.bf16.msra.mxu0 %v2564_v3 }
 0x10e   : > { %2387 = vmatprep.subr.bf16.mxu0 %v2566_v10 }
 0x111   : > { %2388 = vmatpush3.bf16.msra.mxu0 %v2568_v12 }
 0x112   : > { %2389 = vmatprep.subr.bf16.mxu0 %v2570_v15 }
 0x114   : > { %1041 = vmatmul.mubr.bf16.gmra.mrb[24].mxu0 %v2257_v46 }
 0x115   : > { %1050 = vmatprep.mubr.bf16.mxu0 %v2706_v7  ;;  %v2557_v7 = vld [vmem:[%s3660_s4 + $0x48] sm:$0xff]   ;;  %2390 = vmatpush3.bf16.msra.mxu0 %v2572_v17 }
 0x116   : > { %2361 = vmatprep.subr.bf16.mxu1 %v2557_v7  ;;  %2391 = vmatprep.subr.bf16.mxu0 %v2574_v19 }
 0x117   : > { %2362 = vmatpush3.bf16.msra.mxu1 %v2559_v1 }
 0x118   : > { %2363 = vmatprep.subr.bf16.mxu1 %v2561_v6 }
 0x119   : > { %2392 = vmatpush3.bf16.msra.mxu0 %v2576_v22  ;;  %v2585_v22 = vld [vmem:[%s3660_s4 + $0x140] sm:$0xff]  }
 0x11a   : > { %2393 = vmatprep.subr.bf16.mxu0 %v2578_v24 }
 0x11b   : > { %2364 = vmatpush3.bf16.msra.mxu1 %v2563_v9 }
 0x11c   : > { %1051 = vmatmul.mubr.bf16.gmra.mrb[28].mxu0 %v2258_v61  ;;  %2365 = vmatprep.subr.bf16.mxu1 %v2565_v4 }
 0x11d   : > { %2394 = vmatpush3.bf16.msra.mxu0 %v2580_v5 }
 0x11e   : > { %2395 = vmatprep.subr.bf16.mxu0 %v2582_v21 }
 0x11f   : > { %2366 = vmatpush3.bf16.msra.mxu1 %v2567_v11 }
 0x120   : > { %2367 = vmatprep.subr.bf16.mxu1 %v2569_v13 }
 0x121   : > { %2396 = vmatpush3.bf16.msra.mxu0 %v2584_v30 }
 0x123   : > { %2368 = vmatpush3.bf16.msra.mxu1 %v2571_v16 }
 0x124   : > { %2369 = vmatprep.subr.bf16.mxu1 %v2573_v18 }
 0x127   : > { %2370 = vmatpush3.bf16.msra.mxu1 %v2575_v20 }
 0x128   : > { %2371 = vmatprep.subr.bf16.mxu1 %v2577_v23 }
 0x12b   : > { %2372 = vmatpush3.bf16.msra.mxu1 %v2579_v26 }
 0x12c   : > { %2373 = vmatprep.subr.bf16.mxu1 %v2581_v28 }
 0x12f   : > { %2374 = vmatpush3.bf16.msra.mxu1 %v2583_v29 }
 0x130   : > { %2403 = vmatprep.subr.bf16.mxu1 %v2585_v22 }
 0x1ab   : > { %v876_v44 = vpop.f32.mrb[0].mxu0  ;;  %v949_v39 = vpop.f32.mrb[0].mxu1 }
 0x1ac   : > { %v877_v45 = vadd.f32 %v876_v44, %v3246_v37  ;;  %v950_v46 = vadd.f32 %v949_v39, %v3248_v38  ;;  %v878_v50 = vpop.f32.mrb[1].mxu0  ;;  %v951_v47 = vpop.f32.mrb[1].mxu1 }
 0x1ad   : > { %v879_v51 = vadd.f32 %v878_v50, %v3250_v40  ;;  %v952_v52 = vadd.f32 %v951_v47, %v3252_v41  ;;  %v880_v53 = vpop.f32.mrb[2].mxu0  ;;  %v953_v54 = vpop.f32.mrb[2].mxu1 }
 0x1ae   : > { %v1061_v57 = vmax.f32 %v877_v45, 0.0  ;;  %v1063_v58 = vmax.f32 %v950_v46, 0.0  ;;  %v881_v61 = vadd.f32 %v880_v53, %v3246_v37  ;;  %v954_v14 = vadd.f32 %v953_v54, %v3248_v38  ;;  %v882_v25 = vpop.f32.mrb[3].mxu0  ;;  %v955_v62 = vpop.f32.mrb[3].mxu1 }
 0x1af   : > { %v1062_v63 = vmax.f32 %v879_v51, 0.0  ;;  %v1064_v7 = vmax.f32 %v952_v52, 0.0  ;;  %v883_v0 = vadd.f32 %v882_v25, %v3250_v40  ;;  %v956_v1 = vadd.f32 %v955_v62, %v3252_v41 }
 0x1b0   : > { %v1115_v2 = vmul.f32 %v3256_v48, %v1061_v57  ;;  %v1117_v6 = vmul.f32 %v3258_v49, %v1063_v58  ;;  %v1067_v8 = vmax.f32 %v881_v61, 0.0  ;;  %v1069_v9 = vmax.f32 %v954_v14, 0.0 }
 0x1b1   : > { %v1116_v3 = vmul.f32 %v3266_v59, %v1062_v63  ;;  %v1118_v4 = vmul.f32 %v3268_v60, %v1064_v7  ;;  %v1068_v10 = vmax.f32 %v883_v0, 0.0  ;;  %v1070_v11 = vmax.f32 %v956_v1, 0.0 }
 0x1b2   : > { %v1163_v12 = vrot.slane %v1115_v2, 4  ;;  %v1175_v13 = vrot.slane %v1117_v6, 4  ;;  %v1121_v15 = vmul.f32 %v3256_v48, %v1067_v8  ;;  %v1123_v16 = vmul.f32 %v3258_v49, %v1069_v9 }
 0x1b3   : > { %v1169_v17 = vrot.slane %v1116_v3, 4  ;;  %v1181_v18 = vrot.slane %v1118_v4, 4  ;;  %v1122_v19 = vmul.f32 %v3266_v59, %v1068_v10  ;;  %v1124_v20 = vmul.f32 %v3268_v60, %v1070_v11 }
 0x1b4   : > { %v1164_v23 = vmax.f32 %v1115_v2, %v1163_v12  ;;  %v1176_v24 = vmax.f32 %v1117_v6, %v1175_v13  ;;  %v1199_v26 = vrot.slane %v1121_v15, 4  ;;  %v1211_v5 = vrot.slane %v1123_v16, 4 }
 0x1b5   : > { %v1170_v27 = vmax.f32 %v1116_v3, %v1169_v17  ;;  %v1182_v28 = vmax.f32 %v1118_v4, %v1181_v18  ;;  %v1205_v21 = vrot.slane %v1122_v19, 4  ;;  %v1217_v29 = vrot.slane %v1124_v20, 4 }
 0x1b6   : > { %v1165_v30 = vrot.slane %v1164_v23, 2  ;;  %v1177_v31 = vrot.slane %v1176_v24, 2  ;;  %v1200_v32 = vmax.f32 %v1121_v15, %v1199_v26  ;;  %v1212_v33 = vmax.f32 %v1123_v16, %v1211_v5 }
 0x1b7   : > { %v1171_v34 = vrot.slane %v1170_v27, 2  ;;  %v1183_v35 = vrot.slane %v1182_v28, 2  ;;  %v1206_v36 = vmax.f32 %v1122_v19, %v1205_v21  ;;  %v1218_v42 = vmax.f32 %v1124_v20, %v1217_v29  ;;  %v886_v43 = vpop.f32.mrb[4].mxu0  ;;  %v959_v44 = vpop.f32.mrb[4].mxu1 }
 0x1b8   : > { %v1166_v39 = vmax.f32 %v1164_v23, %v1165_v30  ;;  %v1178_v45 = vmax.f32 %v1176_v24, %v1177_v31  ;;  %v1201_v46 = vrot.slane %v1200_v32, 2  ;;  %v1213_v50 = vrot.slane %v1212_v33, 2  ;;  %v888_v47 = vpop.f32.mrb[5].mxu0  ;;  %v961_v51 = vpop.f32.mrb[5].mxu1 }
 0x1b9   : > { %v1172_v52 = vmax.f32 %v1170_v27, %v1171_v34  ;;  %v1184_v53 = vmax.f32 %v1182_v28, %v1183_v35  ;;  %v1207_v54 = vrot.slane %v1206_v36, 2  ;;  %v1219_v57 = vrot.slane %v1218_v42, 2  ;;  %v890_v58 = vpop.f32.mrb[6].mxu0  ;;  %v963_v61 = vpop.f32.mrb[6].mxu1 }
 0x1ba   : > { %v1167_v14 = vrot.slane %v1166_v39, 1  ;;  %v1179_v25 = vrot.slane %v1178_v45, 1  ;;  %v1202_v62 = vmax.f32 %v1200_v32, %v1201_v46  ;;  %v1214_v63 = vmax.f32 %v1212_v33, %v1213_v50  ;;  %v892_v7 = vpop.f32.mrb[7].mxu0  ;;  %v965_v0 = vpop.f32.mrb[7].mxu1 }
 0x1bb   : > { %v1173_v1 = vrot.slane %v1172_v52, 1  ;;  %v1185_v2 = vrot.slane %v1184_v53, 1  ;;  %v1208_v6 = vmax.f32 %v1206_v36, %v1207_v54  ;;  %v1220_v8 = vmax.f32 %v1218_v42, %v1219_v57 }
 0x1bc   : > { %v1168_v9 = vmax.f32 %v1166_v39, %v1167_v14  ;;  %v1180_v3 = vmax.f32 %v1178_v45, %v1179_v25  ;;  %v1203_v4 = vrot.slane %v1202_v62, 1  ;;  %v1215_v10 = vrot.slane %v1214_v63, 1 }
 0x1bd   : > { %v1174_v11 = vmax.f32 %v1172_v52, %v1173_v1  ;;  %v1186_v12 = vmax.f32 %v1184_v53, %v1185_v2  ;;  %v1209_v13 = vrot.slane %v1208_v6, 1  ;;  %v1221_v15 = vrot.slane %v1220_v8, 1 }
 0x1be   : > { %v1451_v16 = vpack.c.bf16 %v1168_v9, %v1168_v9  ;;  %v1453_v17 = vpack.c.bf16 %v1180_v3, %v1180_v3  ;;  %v1204_v18 = vmax.f32 %v1202_v62, %v1203_v4  ;;  %v1216_v19 = vmax.f32 %v1214_v63, %v1215_v10 }
 0x1bf   : > { %v1452_v20 = vpack.c.bf16 %v1174_v11, %v1174_v11  ;;  %v1454_v22 = vpack.c.bf16 %v1186_v12, %v1186_v12  ;;  %v1210_v23 = vmax.f32 %v1208_v6, %v1209_v13  ;;  %v1222_v24 = vmax.f32 %v1220_v8, %v1221_v15 }
 0x1c0   : > { %v1650_v26 = vunpack.c.l.b16 %v1451_v16  ;;  %v1652_v5 = vunpack.c.l.b16 %v1453_v17  ;;  %v1457_v27 = vpack.c.bf16 %v1204_v18, %v1204_v18  ;;  %v1459_v28 = vpack.c.bf16 %v1216_v19, %v1216_v19 }
 0x1c1   : > { %v1651_v21 = vunpack.c.l.b16 %v1452_v20  ;;  %v1653_v29 = vunpack.c.l.b16 %v1454_v22  ;;  %v1458_v30 = vpack.c.bf16 %v1210_v23, %v1210_v23  ;;  %v1460_v31 = vpack.c.bf16 %v1222_v24, %v1222_v24 }
 0x1c2   : > { %v1656_v32 = vunpack.c.l.b16 %v1457_v27  ;;  %v1658_v33 = vunpack.c.l.b16 %v1459_v28  ;;  %v887_v34 = vadd.f32 %v886_v43, %v3246_v37  ;;  %v960_v35 = vadd.f32 %v959_v44, %v3248_v38 }
 0x1c3   : > { %v1657_v36 = vunpack.c.l.b16 %v1458_v30  ;;  %v1659_v42 = vunpack.c.l.b16 %v1460_v31  ;;  %v889_v39 = vadd.f32 %v888_v47, %v3250_v40  ;;  %v962_v45 = vadd.f32 %v961_v51, %v3252_v41  ;;  %v3289_v46 = vpop.f32.mrb[8].mxu0  ;;  %v3291_v50 = vpop.f32.mrb[8].mxu1 }
 0x1c4   : > { %v3294_v52 = vsel %vm1698_vm4, %v1656_v32, %v1650_v26  ;;  %v3297_v53 = vsel %vm1698_vm4, %v1658_v33, %v1652_v5  ;;  %v1073_v54 = vmax.f32 %v887_v34, 0.0  ;;  %v1075_v43 = vmax.f32 %v960_v35, 0.0  ;;  %v3299_v57 = vpop.f32.mrb[9].mxu0  ;;  %v3301_v44 = vpop.f32.mrb[9].mxu1 }
 0x1c5   : > { %v3304_v47 = vsel %vm1698_vm4, %v1657_v36, %v1651_v21  ;;  %v3307_v51 = vsel %vm1698_vm4, %v1659_v42, %v1653_v29  ;;  %v1074_v14 = vmax.f32 %v889_v39, 0.0  ;;  %v1076_v25 = vmax.f32 %v962_v45, 0.0  ;;  %v3309_v62 = vpop.f32.mrb[10].mxu0  ;;  %v3311_v63 = vpop.f32.mrb[10].mxu1 }
 0x1c6   : > { %v1127_v1 = vmul.f32 %v3256_v48, %v1073_v54  ;;  %v1129_v2 = vmul.f32 %v3258_v49, %v1075_v43  ;;  %v891_v6 = vadd.f32 %v890_v58, %v3246_v37  ;;  %v964_v8 = vadd.f32 %v963_v61, %v3248_v38  ;;  %v3317_v9 = vpop.f32.mrb[11].mxu0  ;;  %v3319_v3 = vpop.f32.mrb[11].mxu1 }
 0x1c7   : > { %v1128_v4 = vmul.f32 %v3266_v59, %v1074_v14  ;;  %v1130_v10 = vmul.f32 %v3268_v60, %v1076_v25  ;;  %v893_v11 = vadd.f32 %v892_v7, %v3250_v40  ;;  %v966_v12 = vadd.f32 %v965_v0, %v3252_v41 }
 0x1c8   : > { %v1235_v13 = vrot.slane %v1127_v1, 4  ;;  %v1247_v15 = vrot.slane %v1129_v2, 4  ;;  %v1079_v16 = vmax.f32 %v891_v6, 0.0  ;;  %v1081_v17 = vmax.f32 %v964_v8, 0.0 }
 0x1c9   : > { %v1241_v18 = vrot.slane %v1128_v4, 4  ;;  %v1253_v58 = vrot.slane %v1130_v10, 4  ;;  %v1080_v19 = vmax.f32 %v893_v11, 0.0  ;;  %v1082_v61 = vmax.f32 %v966_v12, 0.0 }
 0x1ca   : > { %v1236_v20 = vmax.f32 %v1127_v1, %v1235_v13  ;;  %v1248_v22 = vmax.f32 %v1129_v2, %v1247_v15  ;;  %v1133_v23 = vmul.f32 %v3256_v48, %v1079_v16  ;;  %v1135_v24 = vmul.f32 %v3258_v49, %v1081_v17 }
 0x1cb   : > { %v1242_v26 = vmax.f32 %v1128_v4, %v1241_v18  ;;  %v1254_v5 = vmax.f32 %v1130_v10, %v1253_v58  ;;  %v1134_v7 = vmul.f32 %v3266_v59, %v1080_v19  ;;  %v1136_v0 = vmul.f32 %v3268_v60, %v1082_v61 }
 0x1cc   : > { %v1237_v27 = vrot.slane %v1236_v20, 2  ;;  %v1249_v28 = vrot.slane %v1248_v22, 2  ;;  %v1271_v21 = vrot.slane %v1133_v23, 4  ;;  %v1283_v29 = vrot.slane %v1135_v24, 4 }
 0x1cd   : > { %v1243_v30 = vrot.slane %v1242_v26, 2  ;;  %v1255_v31 = vrot.slane %v1254_v5, 2  ;;  %v1277_v32 = vrot.slane %v1134_v7, 4  ;;  %v1289_v33 = vrot.slane %v1136_v0, 4 }
 0x1ce   : > { %v1238_v34 = vmax.f32 %v1236_v20, %v1237_v27  ;;  %v1250_v35 = vmax.f32 %v1248_v22, %v1249_v28  ;;  %v1272_v36 = vmax.f32 %v1133_v23, %v1271_v21  ;;  %v1284_v42 = vmax.f32 %v1135_v24, %v1283_v29 }
 0x1cf   : > { %v1244_v39 = vmax.f32 %v1242_v26, %v1243_v30  ;;  %v1256_v45 = vmax.f32 %v1254_v5, %v1255_v31  ;;  %v1278_v54 = vmax.f32 %v1134_v7, %v1277_v32  ;;  %v1290_v43 = vmax.f32 %v1136_v0, %v1289_v33  ;;  %v3329_v14 = vpop.f32.mrb[12].mxu0  ;;  %v3331_v25 = vpop.f32.mrb[12].mxu1 }
 0x1d0   : > { %v1239_v1 = vrot.slane %v1238_v34, 1  ;;  %v1251_v2 = vrot.slane %v1250_v35, 1  ;;  %v1273_v6 = vrot.slane %v1272_v36, 2  ;;  %v1285_v8 = vrot.slane %v1284_v42, 2  ;;  %v3333_v4 = vpop.f32.mrb[13].mxu0  ;;  %v3335_v10 = vpop.f32.mrb[13].mxu1 }
 0x1d1   : > { %v1245_v11 = vrot.slane %v1244_v39, 1  ;;  %v1257_v12 = vrot.slane %v1256_v45, 1  ;;  %v1279_v13 = vrot.slane %v1278_v54, 2  ;;  %v1291_v15 = vrot.slane %v1290_v43, 2  ;;  %v3337_v16 = vpop.f32.mrb[14].mxu0  ;;  %v3339_v17 = vpop.f32.mrb[14].mxu1 }
 0x1d2   : > { %v1240_v18 = vmax.f32 %v1238_v34, %v1239_v1  ;;  %v1252_v58 = vmax.f32 %v1250_v35, %v1251_v2  ;;  %v1274_v19 = vmax.f32 %v1272_v36, %v1273_v6  ;;  %v1286_v61 = vmax.f32 %v1284_v42, %v1285_v8  ;;  %v3341_v20 = vpop.f32.mrb[15].mxu0  ;;  %v3343_v22 = vpop.f32.mrb[15].mxu1 }
 0x1d3   : > { %v1246_v23 = vmax.f32 %v1244_v39, %v1245_v11  ;;  %v1258_v24 = vmax.f32 %v1256_v45, %v1257_v12  ;;  %v1280_v26 = vmax.f32 %v1278_v54, %v1279_v13  ;;  %v1292_v5 = vmax.f32 %v1290_v43, %v1291_v15 }
 0x1d4   : > { %v1463_v7 = vpack.c.bf16 %v1240_v18, %v1240_v18  ;;  %v1465_v0 = vpack.c.bf16 %v1252_v58, %v1252_v58  ;;  %v1275_v27 = vrot.slane %v1274_v19, 1  ;;  %v1287_v28 = vrot.slane %v1286_v61, 1 }
 0x1d5   : > { %v1464_v21 = vpack.c.bf16 %v1246_v23, %v1246_v23  ;;  %v1466_v29 = vpack.c.bf16 %v1258_v24, %v1258_v24  ;;  %v1281_v30 = vrot.slane %v1280_v26, 1  ;;  %v1293_v31 = vrot.slane %v1292_v5, 1 }
 0x1d6   : > { %v1662_v32 = vunpack.c.l.b16 %v1463_v7  ;;  %v1664_v33 = vunpack.c.l.b16 %v1465_v0  ;;  %v1276_v34 = vmax.f32 %v1274_v19, %v1275_v27  ;;  %v1288_v35 = vmax.f32 %v1286_v61, %v1287_v28 }
 0x1d7   : > { %v1663_v36 = vunpack.c.l.b16 %v1464_v21  ;;  %v1665_v42 = vunpack.c.l.b16 %v1466_v29  ;;  %v1282_v1 = vmax.f32 %v1280_v26, %v1281_v30  ;;  %v1294_v2 = vmax.f32 %v1292_v5, %v1293_v31  ;;  %v3345_v39 = vpop.f32.mrb[16].mxu0 }
 0x1d8   : > { %v1701_v45 = vsel %vm1700_vm5, %v1662_v32, %v3294_v52  ;;  %v1720_v54 = vsel %vm1700_vm5, %v1664_v33, %v3297_v53  ;;  %v1469_v43 = vpack.c.bf16 %v1276_v34, %v1276_v34  ;;  %v1471_v6 = vpack.c.bf16 %v1288_v35, %v1288_v35  ;;  %v3351_v8 = vpop.f32.mrb[17].mxu0 }
 0x1d9   : > { %v3355_v11 = vsel %vm1700_vm5, %v1663_v36, %v3304_v47  ;;  %v3359_v12 = vsel %vm1700_vm5, %v1665_v42, %v3307_v51  ;;  %v1470_v13 = vpack.c.bf16 %v1282_v1, %v1282_v1  ;;  %v1472_v15 = vpack.c.bf16 %v1294_v2, %v1294_v2  ;;  %v3361_v18 = vpop.f32.mrb[18].mxu0 }
 0x1da   : > { %3677 = vst [vmem:[#allocation8_spill] sm:$0xff] %v3355_v11  ;;  %3678 = vst [vmem:[#allocation9_spill] sm:$0xff] %v3359_v12  ;;  %v1668_v52 = vunpack.c.l.b16 %v1469_v43  ;;  %v1670_v58 = vunpack.c.l.b16 %v1471_v6  ;;  %v897_v53 = vadd.f32 %v3289_v46, %v3246_v37  ;;  %v970_v19 = vadd.f32 %v3291_v50, %v3248_v38  ;;  %v3367_v61 = vpop.f32.mrb[19].mxu0 }
 0x1db   : > { %v3369_v47 = vunpack.c.l.b16 %v1470_v13  ;;  %v3371_v23 = vunpack.c.l.b16 %v1472_v15  ;;  %v899_v51 = vadd.f32 %v3299_v57, %v3250_v40  ;;  %v972_v24 = vadd.f32 %v3301_v44, %v3252_v41 }
 0x1dc   : > { %v3378_v26 = vsel %vm1702_vm6, %v1668_v52, %v1701_v45  ;;  %v3381_v46 = vsel %vm1702_vm6, %v1670_v58, %v1720_v54  ;;  %v1085_v5 = vmax.f32 %v897_v53, 0.0  ;;  %v1087_v50 = vmax.f32 %v970_v19, 0.0 }
 0x1dd   : > { %3679 = vst [vmem:[#allocation10_spill] sm:$0xff] %v3369_v47  ;;  %3680 = vst [vmem:[#allocation11_spill] sm:$0xff] %v3371_v23  ;;  %v1086_v7 = vmax.f32 %v899_v51, 0.0  ;;  %v1088_v0 = vmax.f32 %v972_v24, 0.0  ;;  %v901_v27 = vadd.f32 %v3309_v62, %v3246_v37  ;;  %v974_v28 = vadd.f32 %v3311_v63, %v3248_v38 }
 0x1de   : > { %v1139_v57 = vmul.f32 %v3256_v48, %v1085_v5  ;;  %v1141_v44 = vmul.f32 %v3258_v49, %v1087_v50  ;;  %v903_v21 = vadd.f32 %v3317_v9, %v3250_v40  ;;  %v976_v29 = vadd.f32 %v3319_v3, %v3252_v41 }
 0x1df   : > { %v1140_v30 = vmul.f32 %v3266_v59, %v1086_v7  ;;  %v1142_v31 = vmul.f32 %v3268_v60, %v1088_v0  ;;  %v1091_v32 = vmax.f32 %v901_v27, 0.0  ;;  %v1093_v33 = vmax.f32 %v974_v28, 0.0  ;;  %v3395_v62 = vpop.f32.mrb[20].mxu0 }
 0x1e0   : > { %v1307_v34 = vrot.slane %v1139_v57, 4  ;;  %v1319_v63 = vrot.slane %v1141_v44, 4  ;;  %v1092_v35 = vmax.f32 %v903_v21, 0.0  ;;  %v1094_v36 = vmax.f32 %v976_v29, 0.0  ;;  %v3397_v42 = vpop.f32.mrb[21].mxu0 }
 0x1e1   : > { %v1313_v1 = vrot.slane %v1140_v30, 4  ;;  %v1325_v2 = vrot.slane %v1142_v31, 4  ;;  %v1145_v9 = vmul.f32 %v3256_v48, %v1091_v32  ;;  %v1147_v3 = vmul.f32 %v3258_v49, %v1093_v33  ;;  %v3401_v45 = vpop.f32.mrb[22].mxu0 }
 0x1e2   : > { %v1308_v54 = vmax.f32 %v1139_v57, %v1307_v34  ;;  %v1320_v43 = vmax.f32 %v1141_v44, %v1319_v63  ;;  %v1146_v6 = vmul.f32 %v3266_v59, %v1092_v35  ;;  %v1148_v13 = vmul.f32 %v3268_v60, %v1094_v36  ;;  %v3405_v15 = vpop.f32.mrb[23].mxu0 }
 0x1e3   : > { %v1314_v52 = vmax.f32 %v1140_v30, %v1313_v1  ;;  %v1326_v58 = vmax.f32 %v1142_v31, %v1325_v2  ;;  %v1343_v53 = vrot.slane %v1145_v9, 4  ;;  %v1355_v19 = vrot.slane %v1147_v3, 4 }
 0x1e4   : > { %v1309_v51 = vrot.slane %v1308_v54, 2  ;;  %v1321_v24 = vrot.slane %v1320_v43, 2  ;;  %v1349_v5 = vrot.slane %v1146_v6, 4  ;;  %v1361_v50 = vrot.slane %v1148_v13, 4 }
 0x1e5   : > { %v1315_v7 = vrot.slane %v1314_v52, 2  ;;  %v1327_v0 = vrot.slane %v1326_v58, 2  ;;  %v1344_v27 = vmax.f32 %v1145_v9, %v1343_v53  ;;  %v1356_v28 = vmax.f32 %v1147_v3, %v1355_v19 }
 0x1e6   : > { %v1310_v57 = vmax.f32 %v1308_v54, %v1309_v51  ;;  %v1322_v44 = vmax.f32 %v1320_v43, %v1321_v24  ;;  %v1350_v21 = vmax.f32 %v1146_v6, %v1349_v5  ;;  %v1362_v29 = vmax.f32 %v1148_v13, %v1361_v50 }
 0x1e7   : > { %v1316_v32 = vmax.f32 %v1314_v52, %v1315_v7  ;;  %v1328_v33 = vmax.f32 %v1326_v58, %v1327_v0  ;;  %v1345_v34 = vrot.slane %v1344_v27, 2  ;;  %v1357_v30 = vrot.slane %v1356_v28, 2  ;;  %v3407_v31 = vpop.f32.mrb[24].mxu0 }
 0x1e8   : > { %v1311_v63 = vrot.slane %v1310_v57, 1  ;;  %v1323_v35 = vrot.slane %v1322_v44, 1  ;;  %v1351_v36 = vrot.slane %v1350_v21, 2  ;;  %v1363_v1 = vrot.slane %v1362_v29, 2  ;;  %v3409_v2 = vpop.f32.mrb[25].mxu0 }
 0x1e9   : > { %v1317_v23 = vrot.slane %v1316_v32, 1  ;;  %v1329_v9 = vrot.slane %v1328_v33, 1  ;;  %v1346_v3 = vmax.f32 %v1344_v27, %v1345_v34  ;;  %v1358_v54 = vmax.f32 %v1356_v28, %v1357_v30  ;;  %v3411_v43 = vpop.f32.mrb[26].mxu0 }
 0x1ea   : > { %v1312_v6 = vmax.f32 %v1310_v57, %v1311_v63  ;;  %v1324_v13 = vmax.f32 %v1322_v44, %v1323_v35  ;;  %v1352_v52 = vmax.f32 %v1350_v21, %v1351_v36  ;;  %v1364_v58 = vmax.f32 %v1362_v29, %v1363_v1  ;;  %v3413_v53 = vpop.f32.mrb[27].mxu0 }
 0x1eb   : > { %v1318_v19 = vmax.f32 %v1316_v32, %v1317_v23  ;;  %v1330_v51 = vmax.f32 %v1328_v33, %v1329_v9  ;;  %v1347_v24 = vrot.slane %v1346_v3, 1  ;;  %v1359_v5 = vrot.slane %v1358_v54, 1 }
 0x1ec   : > { %v1475_v50 = vpack.c.bf16 %v1312_v6, %v1312_v6  ;;  %v1477_v7 = vpack.c.bf16 %v1324_v13, %v1324_v13  ;;  %v1353_v0 = vrot.slane %v1352_v52, 1  ;;  %v1365_v12 = vrot.slane %v1364_v58, 1 }
 0x1ed   : > { %v1476_v47 = vpack.c.bf16 %v1318_v19, %v1318_v19  ;;  %v1478_v11 = vpack.c.bf16 %v1330_v51, %v1330_v51  ;;  %v1348_v27 = vmax.f32 %v1346_v3, %v1347_v24  ;;  %v1360_v28 = vmax.f32 %v1358_v54, %v1359_v5 }
 0x1ee   : > { %v1674_v34 = vunpack.c.l.b16 %v1475_v50  ;;  %v1676_v30 = vunpack.c.l.b16 %v1477_v7  ;;  %v1354_v57 = vmax.f32 %v1352_v52, %v1353_v0  ;;  %v1366_v44 = vmax.f32 %v1364_v58, %v1365_v12 }
 0x1ef   : > { %v3415_v21 = vunpack.c.l.b16 %v1476_v47  ;;  %v3417_v29 = vunpack.c.l.b16 %v1478_v11  ;;  %v1481_v23 = vpack.c.bf16 %v1348_v27, %v1348_v27  ;;  %v1483_v32 = vpack.c.bf16 %v1360_v28, %v1360_v28  ;;  %v3419_v33 = vpop.f32.mrb[28].mxu0 }
 0x1f0   : > { %v1705_v63 = vsel %vm1704_vm7, %v1674_v34, %v3378_v26  ;;  %v1722_v35 = vsel %vm1704_vm7, %v1676_v30, %v3381_v46  ;;  %v1482_v36 = vpack.c.bf16 %v1354_v57, %v1354_v57  ;;  %v1484_v1 = vpack.c.bf16 %v1366_v44, %v1366_v44  ;;  %v3425_v9 = vpop.f32.mrb[29].mxu0 }
 0x1f1   : > { %v1680_v3 = vunpack.c.l.b16 %v1481_v23  ;;  %v1682_v12 = vunpack.c.l.b16 %v1483_v32  ;;  %v907_v11 = vadd.f32 %v3329_v14, %v3246_v37  ;;  %v980_v47 = vadd.f32 %v3331_v25, %v3248_v38  ;;  %v3431_v54 = vpop.f32.mrb[30].mxu0 }
 0x1f2   : > { %v3433_v6 = vunpack.c.l.b16 %v1482_v36  ;;  %v3435_v26 = vunpack.c.l.b16 %v1484_v1  ;;  %v909_v46 = vadd.f32 %v3333_v4, %v3250_v40  ;;  %v982_v13 = vadd.f32 %v3335_v10, %v3252_v41  ;;  %v3441_v52 = vpop.f32.mrb[31].mxu0 }
 0x1f3   : > { %v3444_v58 = vsel %vm1706_vm8, %v1680_v3, %v1705_v63  ;;  %v3447_v14 = vsel %vm1706_vm8, %v1682_v12, %v1722_v35  ;;  %v1097_v25 = vmax.f32 %v907_v11, 0.0  ;;  %v1099_v19 = vmax.f32 %v980_v47, 0.0 }
 0x1f4   : > { %v1098_v51 = vmax.f32 %v909_v46, 0.0  ;;  %v1100_v24 = vmax.f32 %v982_v13, 0.0  ;;  %v911_v5 = vadd.f32 %v3337_v16, %v3246_v37  ;;  %v984_v4 = vadd.f32 %v3339_v17, %v3248_v38 }
 0x1f5   : > { %v1151_v10 = vmul.f32 %v3256_v48, %v1097_v25  ;;  %v1153_v50 = vmul.f32 %v3258_v49, %v1099_v19  ;;  %v913_v7 = vadd.f32 %v3341_v20, %v3250_v40  ;;  %v986_v0 = vadd.f32 %v3343_v22, %v3252_v41 }
 0x1f6   : > { %v1152_v27 = vmul.f32 %v3266_v59, %v1098_v51  ;;  %v1154_v28 = vmul.f32 %v3268_v60, %v1100_v24  ;;  %v1103_v34 = vmax.f32 %v911_v5, 0.0  ;;  %v1105_v30 = vmax.f32 %v984_v4, 0.0 }
 0x1f7   : > { %v1379_v37 = vrot.slane %v1151_v10, 4  ;;  %v1391_v16 = vrot.slane %v1153_v50, 4  ;;  %v1104_v57 = vmax.f32 %v913_v7, 0.0  ;;  %v1106_v38 = vmax.f32 %v986_v0, 0.0 }
 0x1f8   : > { %v1385_v17 = vrot.slane %v1152_v27, 4  ;;  %v1397_v44 = vrot.slane %v1154_v28, 4  ;;  %v1157_v23 = vmul.f32 %v3256_v48, %v1103_v34  ;;  %v1159_v32 = vmul.f32 %v3258_v49, %v1105_v30 }
 0x1f9   : > { %v1380_v40 = vmax.f32 %v1151_v10, %v1379_v37  ;;  %v1392_v20 = vmax.f32 %v1153_v50, %v1391_v16  ;;  %v1158_v41 = vmul.f32 %v3266_v59, %v1104_v57  ;;  %v1160_v22 = vmul.f32 %v3268_v60, %v1106_v38 }
 0x1fa   : > { %v1386_v63 = vmax.f32 %v1152_v27, %v1385_v17  ;;  %v1398_v35 = vmax.f32 %v1154_v28, %v1397_v44  ;;  %v1415_v36 = vrot.slane %v1157_v23, 4  ;;  %v1427_v1 = vrot.slane %v1159_v32, 4 }
 0x1fb   : > { %v1381_v3 = vrot.slane %v1380_v40, 2  ;;  %v1393_v12 = vrot.slane %v1392_v20, 2  ;;  %v1421_v11 = vrot.slane %v1158_v41, 4  ;;  %v1433_v47 = vrot.slane %v1160_v22, 4 }
 0x1fc   : > { %v1387_v46 = vrot.slane %v1386_v63, 2  ;;  %v1399_v13 = vrot.slane %v1398_v35, 2  ;;  %v1416_v25 = vmax.f32 %v1157_v23, %v1415_v36  ;;  %v1428_v48 = vmax.f32 %v1159_v32, %v1427_v1 }
 0x1fd   : > { %v1382_v19 = vmax.f32 %v1380_v40, %v1381_v3  ;;  %v1394_v49 = vmax.f32 %v1392_v20, %v1393_v12  ;;  %v1422_v51 = vmax.f32 %v1158_v41, %v1421_v11  ;;  %v1434_v24 = vmax.f32 %v1160_v22, %v1433_v47 }
 0x1fe   : > { %v1388_v5 = vmax.f32 %v1386_v63, %v1387_v46  ;;  %v1400_v59 = vmax.f32 %v1398_v35, %v1399_v13  ;;  %v1417_v4 = vrot.slane %v1416_v25, 2  ;;  %v1429_v60 = vrot.slane %v1428_v48, 2 }
 0x1ff   : > { %v1383_v10 = vrot.slane %v1382_v19, 1  ;;  %v1395_v50 = vrot.slane %v1394_v49, 1  ;;  %v1423_v7 = vrot.slane %v1422_v51, 2  ;;  %v1435_v0 = vrot.slane %v1434_v24, 2 }
 0x200   : > { %v1389_v27 = vrot.slane %v1388_v5, 1  ;;  %v1401_v28 = vrot.slane %v1400_v59, 1  ;;  %v1418_v34 = vmax.f32 %v1416_v25, %v1417_v4  ;;  %v1430_v30 = vmax.f32 %v1428_v48, %v1429_v60  ;;  %v3489_v4 = vld [vmem:[#allocation4 + $0x20] sm:$0xff]  ;;  %v3491_v60 = vld [vmem:[#allocation4 + $0x28] sm:$0xff] }
 0x201   : > { %v1384_v37 = vmax.f32 %v1382_v19, %v1383_v10  ;;  %v1396_v16 = vmax.f32 %v1394_v49, %v1395_v50  ;;  %v1424_v57 = vmax.f32 %v1422_v51, %v1423_v7  ;;  %v1436_v38 = vmax.f32 %v1434_v24, %v1435_v0 }
 0x202   : > { %v1390_v17 = vmax.f32 %v1388_v5, %v1389_v27  ;;  %v1402_v44 = vmax.f32 %v1400_v59, %v1401_v28  ;;  %v1419_v23 = vrot.slane %v1418_v34, 1  ;;  %v1431_v32 = vrot.slane %v1430_v30, 1 }
 0x203   : > { %v1487_v40 = vpack.c.bf16 %v1384_v37, %v1384_v37  ;;  %v1489_v20 = vpack.c.bf16 %v1396_v16, %v1396_v16  ;;  %v1425_v41 = vrot.slane %v1424_v57, 1  ;;  %v1437_v22 = vrot.slane %v1436_v38, 1 }
 0x204   : > { %v1488_v63 = vpack.c.bf16 %v1390_v17, %v1390_v17  ;;  %v1490_v35 = vpack.c.bf16 %v1402_v44, %v1402_v44  ;;  %v1420_v36 = vmax.f32 %v1418_v34, %v1419_v23  ;;  %v1432_v1 = vmax.f32 %v1430_v30, %v1431_v32 }
 0x205   : > { %v3465_v3 = vunpack.c.l.b16 %v1487_v40  ;;  %v3467_v12 = vunpack.c.l.b16 %v1489_v20  ;;  %v3469_v11 = vmax.f32 %v1424_v57, %v1425_v41  ;;  %v3471_v47 = vmax.f32 %v1436_v38, %v1437_v22 }
 0x206   : > { %v3473_v46 = vunpack.c.l.b16 %v1488_v63  ;;  %v3475_v13 = vunpack.c.l.b16 %v1490_v35  ;;  %v1493_v25 = vpack.c.bf16 %v1420_v36, %v1420_v36  ;;  %v1495_v48 = vpack.c.bf16 %v1432_v1, %v1432_v1 }
 0x207   : > { %v1023_v19 = vadd.f32 %v3345_v39, %v3262_v55  ;;  %v1025_v49 = vadd.f32 %v3351_v8, %v3264_v56  ;;  %v1027_v51 = vadd.f32 %v3361_v18, %v3262_v55  ;;  %v1029_v24 = vadd.f32 %v3367_v61, %v3264_v56 }
 0x208   : > { %v3485_v5 = vunpack.c.l.b16 %v1493_v25  ;;  %v3487_v59 = vunpack.c.l.b16 %v1495_v48  ;;  %v1033_v39 = vadd.f32 %v3395_v62, %v3262_v55  ;;  %v1035_v8 = vadd.f32 %v3397_v42, %v3264_v56 }
 0x209   : > { %v1065_v10 = vmax.f32 %v1023_v19, 0.0  ;;  %v1066_v50 = vmax.f32 %v1025_v49, 0.0  ;;  %v1071_v18 = vmax.f32 %v1027_v51, 0.0  ;;  %v1072_v7 = vmax.f32 %v1029_v24, 0.0 }
 0x20a   : > { %v1077_v0 = vmax.f32 %v1033_v39, 0.0  ;;  %v1078_v61 = vmax.f32 %v1035_v8, 0.0  ;;  %v1037_v27 = vadd.f32 %v3401_v45, %v3262_v55  ;;  %v1039_v28 = vadd.f32 %v3405_v15, %v3264_v56 }
 0x20b   : > { %v1119_v34 = vmul.f32 %v3489_v4, %v1065_v10  ;;  %v1120_v30 = vmul.f32 %v3491_v60, %v1066_v50  ;;  %v1125_v62 = vmul.f32 %v3489_v4, %v1071_v18  ;;  %v1126_v42 = vmul.f32 %v3491_v60, %v1072_v7 }
 0x20c   : > { %v1131_v37 = vmul.f32 %v3489_v4, %v1077_v0  ;;  %v1132_v16 = vmul.f32 %v3491_v60, %v1078_v61  ;;  %v1083_v57 = vmax.f32 %v1037_v27, 0.0  ;;  %v1084_v38 = vmax.f32 %v1039_v28, 0.0 }
 0x20d   : > { %v1187_v17 = vrot.slane %v1119_v34, 4  ;;  %v1193_v44 = vrot.slane %v1120_v30, 4  ;;  %v1223_v45 = vrot.slane %v1125_v62, 4  ;;  %v1229_v23 = vrot.slane %v1126_v42, 4 }
 0x20e   : > { %v1259_v32 = vrot.slane %v1131_v37, 4  ;;  %v1265_v15 = vrot.slane %v1132_v16, 4  ;;  %v1137_v40 = vmul.f32 %v3489_v4, %v1083_v57  ;;  %v1138_v20 = vmul.f32 %v3491_v60, %v1084_v38 }
 0x20f   : > { %v1188_v41 = vmax.f32 %v1119_v34, %v1187_v17  ;;  %v1194_v22 = vmax.f32 %v1120_v30, %v1193_v44  ;;  %v1224_v63 = vmax.f32 %v1125_v62, %v1223_v45  ;;  %v1230_v35 = vmax.f32 %v1126_v42, %v1229_v23 }
 0x210   : > { %v1260_v36 = vmax.f32 %v1131_v37, %v1259_v32  ;;  %v1266_v1 = vmax.f32 %v1132_v16, %v1265_v15  ;;  %v1295_v25 = vrot.slane %v1137_v40, 4  ;;  %v1301_v48 = vrot.slane %v1138_v20, 4 }
 0x211   : > { %v1189_v19 = vrot.slane %v1188_v41, 2  ;;  %v1195_v49 = vrot.slane %v1194_v22, 2  ;;  %v1225_v51 = vrot.slane %v1224_v63, 2  ;;  %v1231_v24 = vrot.slane %v1230_v35, 2 }
 0x212   : > { %v1261_v39 = vrot.slane %v1260_v36, 2  ;;  %v1267_v8 = vrot.slane %v1266_v1, 2  ;;  %v1296_v10 = vmax.f32 %v1137_v40, %v1295_v25  ;;  %v1302_v50 = vmax.f32 %v1138_v20, %v1301_v48 }
 0x213   : > { %v1190_v18 = vmax.f32 %v1188_v41, %v1189_v19  ;;  %v1196_v7 = vmax.f32 %v1194_v22, %v1195_v49  ;;  %v1226_v0 = vmax.f32 %v1224_v63, %v1225_v51  ;;  %v1232_v61 = vmax.f32 %v1230_v35, %v1231_v24 }
 0x214   : > { %v1262_v27 = vmax.f32 %v1260_v36, %v1261_v39  ;;  %v1268_v28 = vmax.f32 %v1266_v1, %v1267_v8  ;;  %v1297_v34 = vrot.slane %v1296_v10, 2  ;;  %v1303_v30 = vrot.slane %v1302_v50, 2 }
 0x215   : > { %v1191_v62 = vrot.slane %v1190_v18, 1  ;;  %v1197_v42 = vrot.slane %v1196_v7, 1  ;;  %v1227_v37 = vrot.slane %v1226_v0, 1  ;;  %v1233_v16 = vrot.slane %v1232_v61, 1 }
 0x216   : > { %v1263_v57 = vrot.slane %v1262_v27, 1  ;;  %v1269_v38 = vrot.slane %v1268_v28, 1  ;;  %v1298_v17 = vmax.f32 %v1296_v10, %v1297_v34  ;;  %v1304_v44 = vmax.f32 %v1302_v50, %v1303_v30 }
 0x217   : > { %v1192_v45 = vmax.f32 %v1190_v18, %v1191_v62  ;;  %v1198_v23 = vmax.f32 %v1196_v7, %v1197_v42  ;;  %v1228_v32 = vmax.f32 %v1226_v0, %v1227_v37  ;;  %v1234_v15 = vmax.f32 %v1232_v61, %v1233_v16 }
 0x218   : > { %v1264_v40 = vmax.f32 %v1262_v27, %v1263_v57  ;;  %v1270_v20 = vmax.f32 %v1268_v28, %v1269_v38  ;;  %v1299_v41 = vrot.slane %v1298_v17, 1  ;;  %v1305_v22 = vrot.slane %v1304_v44, 1 }
 0x219   : > { %v1455_v63 = vpack.c.bf16 %v1192_v45, %v1192_v45  ;;  %v1456_v35 = vpack.c.bf16 %v1198_v23, %v1198_v23  ;;  %v1461_v36 = vpack.c.bf16 %v1228_v32, %v1228_v32  ;;  %v1462_v1 = vpack.c.bf16 %v1234_v15, %v1234_v15 }
 0x21a   : > { %v1467_v25 = vpack.c.bf16 %v1264_v40, %v1264_v40  ;;  %v1468_v48 = vpack.c.bf16 %v1270_v20, %v1270_v20  ;;  %v1300_v19 = vmax.f32 %v1298_v17, %v1299_v41  ;;  %v1306_v49 = vmax.f32 %v1304_v44, %v1305_v22  ;;  %v3681_v17 = vld [vmem:[#allocation8_spill] sm:$0xff]  ;;  %v3682_v44 = vld [vmem:[#allocation10_spill] sm:$0xff]  ;;  %v3683_v22 = vld [vmem:[#allocation9_spill] sm:$0xff] }
 0x21b   : > { %v1654_v51 = vunpack.c.l.b16 %v1455_v63  ;;  %v1655_v24 = vunpack.c.l.b16 %v1456_v35  ;;  %v1660_v39 = vunpack.c.l.b16 %v1461_v36  ;;  %v1661_v8 = vunpack.c.l.b16 %v1462_v1 }
 0x21c   : > { %v1666_v10 = vunpack.c.l.b16 %v1467_v25  ;;  %v1667_v50 = vunpack.c.l.b16 %v1468_v48  ;;  %v1473_v18 = vpack.c.bf16 %v1300_v19, %v1300_v19  ;;  %v1474_v7 = vpack.c.bf16 %v1306_v49, %v1306_v49 }
 0x21d   : > { %v1733_v0 = vsel %vm1698_vm4, %v1660_v39, %v1654_v51  ;;  %v1740_v61 = vsel %vm1698_vm4, %v1661_v8, %v1655_v24  ;;  %v1043_v27 = vadd.f32 %v3407_v31, %v3262_v55  ;;  %v1045_v28 = vadd.f32 %v3409_v2, %v3264_v56 }
 0x21e   : > { %v1734_v34 = vsel %vm1700_vm5, %v1666_v10, %v1733_v0  ;;  %v3517_v30 = vsel %vm1700_vm5, %v1667_v50, %v1740_v61  ;;  %v1672_v62 = vunpack.c.l.b16 %v1473_v18  ;;  %v3519_v42 = vunpack.c.l.b16 %v1474_v7 }
 0x21f   : > { %v1089_v37 = vmax.f32 %v1043_v27, 0.0  ;;  %v1090_v16 = vmax.f32 %v1045_v28, 0.0  ;;  %v1047_v57 = vadd.f32 %v3411_v43, %v3262_v55  ;;  %v1049_v38 = vadd.f32 %v3413_v53, %v3264_v56 }
 0x220   : > { %v3526_v31 = vsel %vm1702_vm6, %v1672_v62, %v1734_v34  ;;  %v1494_v2 = vpack.c.bf16 %v3469_v11, %v3469_v11  ;;  %v1714_v45 = vsel %vm1702_vm6, %v3682_v44, %v3681_v17  ;;  %v1496_v23 = vpack.c.bf16 %v3471_v47, %v3471_v47  ;;  %v3684_v11 = vld [vmem:[#allocation11_spill] sm:$0xff] }
 0x221   : > { %v1143_v32 = vmul.f32 %v3489_v4, %v1089_v37  ;;  %v1144_v43 = vmul.f32 %v3491_v60, %v1090_v16  ;;  %v1095_v15 = vmax.f32 %v1047_v57, 0.0  ;;  %v1096_v40 = vmax.f32 %v1049_v38, 0.0 }
 0x222   : > { %v1693_v53 = vunpack.c.l.b16 %v1494_v2  ;;  %v1715_v20 = vsel %vm1704_vm7, %v3415_v21, %v1714_v45  ;;  %v1695_v41 = vunpack.c.l.b16 %v1496_v23  ;;  %v1728_v63 = vsel %vm1702_vm6, %v3684_v11, %v3683_v22  ;;  %v2587_v45 = vld [vmem:[%s3660_s4 + $0x148] sm:$0xff]   ;;  %v2589_v11 = vld [vmem:[%s3660_s4 + $0x150] sm:$0xff]  }
 0x223   : > { %v1331_v35 = vrot.slane %v1143_v32, 4  ;;  %v1337_v36 = vrot.slane %v1144_v43, 4  ;;  %v1149_v1 = vmul.f32 %v3489_v4, %v1095_v15  ;;  %v1150_v47 = vmul.f32 %v3491_v60, %v1096_v40 }
 0x224   : > { %v1716_v25 = vsel %vm1706_vm8, %v3433_v6, %v1715_v20  ;;  %v1729_v48 = vsel %vm1704_vm7, %v3417_v29, %v1728_v63  ;;  %v1709_v21 = vsel %vm1708_vm9, %v3465_v3, %v3444_v58  ;;  %v1724_v19 = vsel %vm1708_vm9, %v3467_v12, %v3447_v14 }
 0x225   : > { %v1332_v49 = vmax.f32 %v1143_v32, %v1331_v35  ;;  %v1338_v51 = vmax.f32 %v1144_v43, %v1337_v36  ;;  %v1367_v24 = vrot.slane %v1149_v1, 4  ;;  %v1373_v39 = vrot.slane %v1150_v47, 4 }
 0x226   : > { %v1717_v8 = vsel %vm1708_vm9, %v3473_v46, %v1716_v25  ;;  %v1730_v6 = vsel %vm1706_vm8, %v3435_v26, %v1729_v48  ;;  %v1711_v29 = vsel %vm1710_vm10, %v3485_v5, %v1709_v21  ;;  %v1725_v58 = vsel %vm1710_vm10, %v3487_v59, %v1724_v19  ;;  %v2586_v59 = vld [vmem:[%s3660_s4 + $0x100] sm:$0xff]  }
 0x227   : > { %v1333_v3 = vrot.slane %v1332_v49, 2  ;;  %v1339_v10 = vrot.slane %v1338_v51, 2  ;;  %v1368_v50 = vmax.f32 %v1149_v1, %v1367_v24  ;;  %v1374_v14 = vmax.f32 %v1150_v47, %v1373_v39 }
 0x228   : > { %v1718_v12 = vsel %vm1710_vm10, %v1693_v53, %v1717_v8  ;;  %v1731_v18 = vsel %vm1708_vm9, %v3475_v13, %v1730_v6  ;;  %v1747_v7 = vpack.c.b16 %v1711_v29, %v1711_v29  ;;  %v1749_v46 = vpack.c.b16 %v1725_v58, %v1725_v58 }
 0x229   : > { %v1334_v0 = vmax.f32 %v1332_v49, %v1333_v3  ;;  %v1340_v61 = vmax.f32 %v1338_v51, %v1339_v10  ;;  %v1369_v26 = vrot.slane %v1368_v50, 2  ;;  %v1375_v27 = vrot.slane %v1374_v14, 2  ;;  %v2590_v51 = vld [vmem:[%s3660_s4 + $0x110] sm:$0xff]  }
 0x22a   : > { %v1748_v28 = vpack.c.b16 %v1718_v12, %v1718_v12  ;;  %v1732_v5 = vsel %vm1710_vm10, %v1695_v41, %v1731_v18  ;;  %v1053_v34 = vadd.f32 %v3419_v33, %v3262_v55  ;;  %v1055_v62 = vadd.f32 %v3425_v9, %v3264_v56 }
 0x22b   : > { %v1335_v13 = vrot.slane %v1334_v0, 1  ;;  %v1341_v37 = vrot.slane %v1340_v61, 1  ;;  %v1370_v16 = vmax.f32 %v1368_v50, %v1369_v26  ;;  %v1376_v57 = vmax.f32 %v1374_v14, %v1375_v27 }
 0x22c   : > { %2079 = vmatprep.mubr.bf16.mxu1 %v1748_v28  ;;  %v1750_v38 = vpack.c.b16 %v1732_v5, %v1732_v5  ;;  %v1101_v2 = vmax.f32 %v1053_v34, 0.0  ;;  %v1102_v17 = vmax.f32 %v1055_v62, 0.0  ;;  %v1057_v44 = vadd.f32 %v3431_v54, %v3262_v55  ;;  %v2588_v55 = vld [vmem:[%s3660_s4 + $0x108] sm:$0xff]   ;;  %v2594_v34 = vld [vmem:[%s3660_s4 + $0x120] sm:$0xff]  }
 0x22d   : > { %v1336_v23 = vmax.f32 %v1334_v0, %v1335_v13  ;;  %v1342_v33 = vmax.f32 %v1340_v61, %v1341_v37  ;;  %v1371_v32 = vrot.slane %v1370_v16, 1  ;;  %v1377_v43 = vrot.slane %v1376_v57, 1  ;;  %2080 = vmatmul.mubr.bf16.vlgmr.msra.gmra.mrb[16].mxu1 %v1747_v7  ;;  %v2595_v62 = vld [vmem:[%s3660_s4 + $0x168] sm:$0xff]  }
 0x22e   : > { %2119 = vmatprep.mubr.bf16.mxu0 %v1750_v38  ;;  %2404 = vmatpush3.bf16.msra.mxu1 %v2586_v59  ;;  %v1155_v9 = vmul.f32 %v3489_v4, %v1101_v2  ;;  %v1156_v15 = vmul.f32 %v3491_v60, %v1102_v17  ;;  %v1107_v40 = vmax.f32 %v1057_v44, 0.0  ;;  %v1059_v53 = vadd.f32 %v3441_v52, %v3264_v56 }
 0x22f   : > { %v1479_v54 = vpack.c.bf16 %v1336_v23, %v1336_v23  ;;  %v1480_v20 = vpack.c.bf16 %v1342_v33, %v1342_v33  ;;  %v1372_v41 = vmax.f32 %v1370_v16, %v1371_v32  ;;  %v1378_v22 = vmax.f32 %v1376_v57, %v1377_v43  ;;  %2120 = vmatmul.mubr.bf16.vlgmr.msra.gmra.mrb[32].mxu0 %v1749_v46  ;;  %v2597_v23 = vld [vmem:[%s3660_s4 + $0x170] sm:$0xff]  }
 0x230   : > { %v1403_v63 = vrot.slane %v1155_v9, 4  ;;  %v1409_v35 = vrot.slane %v1156_v15, 4  ;;  %v1161_v36 = vmul.f32 %v3489_v4, %v1107_v40  ;;  %2405 = vmatprep.subr.bf16.mxu1 %v2587_v45  ;;  %v1108_v1 = vmax.f32 %v1059_v53, 0.0  ;;  %v2591_v4 = vld [vmem:[%s3660_s4 + $0x158] sm:$0xff]   ;;  %v2596_v45 = vld [vmem:[%s3660_s4 + $0x128] sm:$0xff]  }
 0x231   : > { %v1678_v56 = vunpack.c.l.b16 %v1479_v54  ;;  %v1679_v52 = vunpack.c.l.b16 %v1480_v20  ;;  %v1485_v47 = vpack.c.bf16 %v1372_v41, %v1372_v41  ;;  %v1486_v25 = vpack.c.bf16 %v1378_v22, %v1378_v22  ;;  %v2600_v41 = vld [vmem:[%s3660_s4 + $0x138] sm:$0xff]  }
 0x232   : > { %v1404_v48 = vmax.f32 %v1155_v9, %v1403_v63  ;;  %v1410_v21 = vmax.f32 %v1156_v15, %v1409_v35  ;;  %v1439_v19 = vrot.slane %v1161_v36, 4  ;;  %v1162_v49 = vmul.f32 %v3491_v60, %v1108_v1  ;;  %2406 = vmatpush3.bf16.msra.mxu1 %v2588_v55  ;;  %v2598_v15 = vld [vmem:[%s3660_s4 + $0x130] sm:$0xff]   ;;  %v2599_v55 = vld [vmem:[%s3660_s4 + $0x178] sm:$0xff]   ;;  %v2307_v63 = vld [vmem:[%s3661_s5] ss:$0 sm:$0xff] }
 0x233   : > { %v1684_v24 = vunpack.c.l.b16 %v1485_v47  ;;  %v1685_v39 = vunpack.c.l.b16 %v1486_v25  ;;  %2407 = vmatprep.subr.bf16.mxu1 %v2589_v11  ;;  %v1742_v8 = vsel %vm1702_vm6, %v3519_v42, %v3517_v30  ;;  %v1736_v6 = vsel %vm1704_vm7, %v1678_v56, %v3526_v31  ;;  %v2592_v30 = vld [vmem:[%s3660_s4 + $0x118] sm:$0xff]   ;;  %v2593_v42 = vld [vmem:[%s3660_s4 + $0x160] sm:$0xff]  }
 0x234   : > { %v1405_v60 = vrot.slane %v1404_v48, 2  ;;  %v1411_v29 = vrot.slane %v1410_v21, 2  ;;  %v1440_v58 = vmax.f32 %v1161_v36, %v1439_v19  ;;  %v1445_v3 = vrot.slane %v1162_v49, 4 }
 0x235   : > { %v1743_v10 = vsel %vm1704_vm7, %v1679_v52, %v1742_v8  ;;  %v1737_v50 = vsel %vm1706_vm8, %v1684_v24, %v1736_v6 }
 0x236   : > { %v1406_v14 = vmax.f32 %v1404_v48, %v1405_v60  ;;  %v1412_v12 = vmax.f32 %v1410_v21, %v1411_v29  ;;  %v1441_v18 = vrot.slane %v1440_v58, 2  ;;  %v1446_v7 = vmax.f32 %v1162_v49, %v1445_v3  ;;  %2408 = vmatpush3.bf16.msra.mxu1 %v2590_v51 }
 0x237   : > { %2409 = vmatprep.subr.bf16.mxu1 %v2591_v4  ;;  %v1744_v31 = vsel %vm1706_vm8, %v1685_v39, %v1743_v10 }
 0x238   : > { %v1407_v46 = vrot.slane %v1406_v14, 1  ;;  %v1413_v0 = vrot.slane %v1412_v12, 1  ;;  %v1442_v61 = vmax.f32 %v1440_v58, %v1441_v18  ;;  %v1447_v26 = vrot.slane %v1446_v7, 2 }
 0x23a   : > { %v1408_v27 = vmax.f32 %v1406_v14, %v1407_v46  ;;  %v1414_v28 = vmax.f32 %v1412_v12, %v1413_v0  ;;  %v1443_v5 = vrot.slane %v1442_v61, 1  ;;  %v1448_v59 = vmax.f32 %v1446_v7, %v1447_v26  ;;  %2410 = vmatpush3.bf16.msra.mxu1 %v2592_v30 }
 0x23b   : > { %2411 = vmatprep.subr.bf16.mxu1 %v2593_v42 }
 0x23c   : > { %v1491_v13 = vpack.c.bf16 %v1408_v27, %v1408_v27  ;;  %v1492_v37 = vpack.c.bf16 %v1414_v28, %v1414_v28  ;;  %v1444_v16 = vmax.f32 %v1442_v61, %v1443_v5  ;;  %v1449_v57 = vrot.slane %v1448_v59, 1 }
 0x23e   : > { %v1690_v38 = vunpack.c.l.b16 %v1491_v13  ;;  %v1691_v2 = vunpack.c.l.b16 %v1492_v37  ;;  %v1497_v17 = vpack.c.bf16 %v1444_v16, %v1444_v16  ;;  %v1450_v44 = vmax.f32 %v1448_v59, %v1449_v57  ;;  %2412 = vmatpush3.bf16.msra.mxu1 %v2594_v34 }
 0x23f   : > { %2413 = vmatprep.subr.bf16.mxu1 %v2595_v62 }
 0x240   : > { %v1696_v33 = vunpack.c.l.b16 %v1497_v17  ;;  %v1498_v32 = vpack.c.bf16 %v1450_v44, %v1450_v44  ;;  %v1745_v43 = vsel %vm1708_vm9, %v1691_v2, %v1744_v31  ;;  %v1738_v9 = vsel %vm1708_vm9, %v1690_v38, %v1737_v50 }
 0x242   : > { %2414 = vmatpush3.bf16.msra.mxu1 %v2596_v45  ;;  %v1697_v40 = vunpack.c.l.b16 %v1498_v32  ;;  %v1739_v53 = vsel %vm1710_vm10, %v1696_v33, %v1738_v9 }
 0x243   : > { %2415 = vmatprep.subr.bf16.mxu1 %v2597_v23  ;;  %v1751_v22 = vpack.c.b16 %v1739_v53, %v1739_v53 }
 0x244   : > { %v1746_v54 = vsel %vm1710_vm10, %v1697_v40, %v1745_v43 }
 0x245   : > { %v1752_v20 = vpack.c.b16 %v1746_v54, %v1746_v54 }
 0x246   : > { %2416 = vmatpush3.bf16.msra.mxu1 %v2598_v15 }
 0x247   : > { %2417 = vmatprep.subr.bf16.mxu1 %v2599_v55  ;;  %2159 = vmatprep.mubr.bf16.mxu1 %v1752_v20 }
 0x24a   : > { %2418 = vmatpush3.bf16.msra.mxu1 %v2600_v41 }
 0x24d   : > { %2160 = vmatmul.mubr.bf16.vlgmr.msra.gmra.mrb[20].mxu1 %v1751_v22 }
 0x300   : > { %v2375_v11 = vpop.f32.mrb[16].mxu1 }
 0x301   : > { %v2376_v35 = vpop.f32.mrb[17].mxu1 }
 0x302   : > { %v2397_v36 = vpop.f32.mrb[32].mxu0  ;;  %v2377_v1 = vadd.f32 %v2376_v35, %v2375_v11  ;;  %v2378_v56 = vpop.f32.mrb[18].mxu1 }
 0x303   : > { %v2398_v52 = vpop.f32.mrb[33].mxu0  ;;  %v2379_v47 = vpop.f32.mrb[19].mxu1 }
 0x304   : > { %v2082_v25 = vadd.f32 %v2377_v1, %v2307_v63  ;;  %v2399_v48 = vadd.f32 %v2398_v52, %v2397_v36  ;;  %v2400_v21 = vpop.f32.mrb[34].mxu0 }
 0x305   : > { %v2401_v19 = vpop.f32.mrb[35].mxu0 }
 0x306   : > { %v2122_v49 = vadd.f32 %v2399_v48, %v2082_v25 }
 0x320   : > { %v2419_v51 = vpop.f32.mrb[20].mxu1 }
 0x321   : > { %v2420_v24 = vpop.f32.mrb[21].mxu1 }
 0x322   : > { %v2421_v39 = vadd.f32 %v2420_v24, %v2419_v51  ;;  %v2422_v4 = vpop.f32.mrb[22].mxu1 }
 0x323   : > { %v2423_v8 = vpop.f32.mrb[23].mxu1 }
 0x324   : > { %v2162_v6 = vadd.f32 %v2421_v39, %v2122_v49 }
 0x326   : > { %2168 = vst.msk [vmem:[%s283_s7] sm:$0xff] %vm2167_vm11, %v2162_v6 }
 0x327 PF: > { %p17_p4 = scmp.ge.s32.totalorder %s2764_s26, 4   ;;  %s3685_s21 = smov %s2689_s22 }
 0x328   : > { %s3686_s22 = smov %s2693_s23  ;;  %s3687_s23 = smov %s2774_s29 }
 0x329   : > { %s3688_s24 = smov %s2764_s26  ;;  %19 = sbr.rel (!%p17_p4) target bundleno = 4 (0x4), region = 88 }
 0x330   :  { %2188 = vsyncpa [#allocation3], 1 }
 0x331   :  { %2190 = vsyncpa [#allocation3 + $0x1], 1 }
 0x332   :  { %2191 = vsyncpa [#allocation5], 1 }

</bundles_post_ra>
